<compile_context>
chip_gen: v6e
topology: v6e:2x2x1
jax: 0.10.0
libtpu: 0.0.40
codegen_flags: <defaults>
</compile_context>

<pallas_src>
import jax
import jax.numpy as jnp
from jax import lax
from jax.experimental import pallas as pl
from jax.experimental.pallas import tpu as pltpu


def _nonlocal_flash_kernel(xq_ref, xk_ref, wt_ref, bt_ref, wpg_ref, bpg_ref,
                           ww_ref, bw_ref, o_ref,
                           theta_sc, m_sc, l_sc, acc_sc):
    ki = pl.program_id(2)
    nk = pl.num_programs(2)
    F = theta_sc.shape[1]

    # Once per query tile: theta projection + flash state init.
    @pl.when(ki == 0)
    def _init():
        xq = xq_ref[0]                                                    # (C, TQ)
        th_t = jnp.dot(wt_ref[...], xq,
                       preferred_element_type=jnp.float32) + bt_ref[...]  # (F, TQ)
        theta_sc[...] = jnp.transpose(th_t)                               # (TQ, F)
        m_sc[...] = jnp.full(m_sc.shape, -jnp.inf, dtype=m_sc.dtype)
        l_sc[...] = jnp.zeros(l_sc.shape, dtype=l_sc.dtype)
        acc_sc[...] = jnp.zeros(acc_sc.shape, dtype=acc_sc.dtype)

    # Fused phi/g projection for the current KV tile: (2F, TKV).
    xk = xk_ref[0]                                                        # (C, TKV)
    pg = jnp.dot(wpg_ref[...], xk,
                 preferred_element_type=jnp.float32) + bpg_ref[...]
    phi_t = pg[:F, :]                                                     # (F, TKV)
    g_t = pg[F:, :]                                                       # (F, TKV)

    # scores (TQ, TKV) = theta @ phi^T (phi is already channel-major -> plain NN dot)
    s = jnp.dot(theta_sc[...], phi_t, preferred_element_type=jnp.float32)

    # Online softmax update.
    m_prev = m_sc[...]
    m_new = jnp.maximum(m_prev, jnp.max(s, axis=-1, keepdims=True))       # (TQ, 1)
    alpha = jnp.exp(m_prev - m_new)
    p = jnp.exp(s - m_new)                                                # (TQ, TKV)
    l_sc[...] = alpha * l_sc[...] + jnp.sum(p, axis=-1, keepdims=True)
    pv = lax.dot_general(p, g_t, (((1,), (1,)), ((), ())),                # (TQ, F)
                         preferred_element_type=jnp.float32)
    acc_sc[...] = alpha * acc_sc[...] + pv
    m_sc[...] = m_new

    # Last KV tile: normalize once per row, output projection, residual.
    @pl.when(ki == nk - 1)
    def _finalize():
        # Exact reciprocal to keep 1e-4 parity; approx=True is fine for looser tolerances.
        y = acc_sc[...] * pl.reciprocal(l_sc[...], approx=False)          # (TQ, F)
        w_out = lax.dot_general(ww_ref[...], y, (((1,), (1,)), ((), ())), # (C, TQ)
                                preferred_element_type=jnp.float32)
        xq = xq_ref[0]
        o_ref[0] = (xq.astype(jnp.float32) + w_out + bw_ref[...]).astype(o_ref.dtype)


def _pick_tile(n, preferred):
    """Largest multiple of 128 <= preferred that divides n, else the full extent."""
    if n % 128 != 0:
        return n
    t = min(preferred, n)
    t -= t % 128
    while n % t != 0:
        t -= 128
    return t


def nonlocal_pallas(x_nchw, params, *, tq=None, tkv=None):
    """x_nchw: (B, C, H, W).  params: PyTorch-layout weights (out_ch, in_ch) / (out_ch,)."""
    B, C, H, W = x_nchw.shape
    N = H * W
    F = params["wt"].shape[0]

    # NCHW -> channel-major (B, C, N): pure reshape, no transpose. N lands on lanes.
    x_cn = x_nchw.reshape(B, C, N)

    if tq is None:
        tq = _pick_tile(N, 256)
    if tkv is None:
        tkv = _pick_tile(N, 512)
    assert N % tq == 0 and N % tkv == 0, "spatial size must be divisible by tiles"

    wt = params["wt"]                                                     # (F, C)
    bt = params["bt"].reshape(F, 1).astype(jnp.float32)
    wpg = jnp.concatenate([params["wp"], params["wg"]], axis=0)           # (2F, C)
    bpg = jnp.concatenate([params["bp"], params["bg"]],
                          axis=0).reshape(2 * F, 1).astype(jnp.float32)
    ww = params["ww"]                                                     # (C, F)
    bw = params["bw"].reshape(C, 1).astype(jnp.float32)

    wspec = lambda a: pl.BlockSpec(a.shape, lambda b, qi, ki: (0, 0))

    cost = pl.CostEstimate(
        flops=B * (8 * N * C * F + 4 * N * N * F),
        transcendentals=B * N * N,
        bytes_accessed=4 * (2 * B * C * N + 4 * C * F + 3 * F + C),
    )

    out_cn = pl.pallas_call(
        _nonlocal_flash_kernel,
        out_shape=jax.ShapeDtypeStruct((B, C, N), x_cn.dtype),
        grid_spec=pltpu.PrefetchScalarGridSpec(
            num_scalar_prefetch=0,
            grid=(B, N // tq, N // tkv),
            in_specs=[
                pl.BlockSpec((1, C, tq), lambda b, qi, ki: (b, 0, qi)),   # x, query tile
                pl.BlockSpec((1, C, tkv), lambda b, qi, ki: (b, 0, ki)),  # x, KV tile
                wspec(wt), wspec(bt),
                wspec(wpg), wspec(bpg),
                wspec(ww), wspec(bw),
            ],
            out_specs=pl.BlockSpec((1, C, tq), lambda b, qi, ki: (b, 0, qi)),
            scratch_shapes=[
                pltpu.VMEM((tq, F), jnp.float32),   # cached theta tile
                pltpu.VMEM((tq, 1), jnp.float32),   # running max
                pltpu.VMEM((tq, 1), jnp.float32),   # running sum
                pltpu.VMEM((tq, F), jnp.float32),   # output accumulator
            ],
        ),
        compiler_params=pltpu.CompilerParams(
            dimension_semantics=("parallel", "parallel", "arbitrary"),
            vmem_limit_bytes=48 * 1024 * 1024,
        ),
        cost_estimate=cost,
    )(x_cn, x_cn, wt, bt, wpg, bpg, ww, bw)

    return out_cn.reshape(B, C, H, W)


def nonlocal_reference(x_nchw, params):
    """Pure-JAX reference matching the PyTorch forward (PyTorch weight layout)."""
    B, C, H, W = x_nchw.shape
    N = H * W
    x = x_nchw.reshape(B, C, N).astype(jnp.float32)                       # (B, C, N)
    theta = jnp.einsum("fc,bcn->bnf", params["wt"], x) + params["bt"]     # (B, N, F)
    phi = jnp.einsum("fc,bcn->bfn", params["wp"], x) + params["bp"][:, None]
    g = jnp.einsum("fc,bcn->bnf", params["wg"], x) + params["bg"]
    attn = jax.nn.softmax(jnp.einsum("bnf,bfm->bnm", theta, phi), axis=-1)
    y = jnp.einsum("bnm,bmf->bnf", attn, g)                               # (B, N, F)
    out = x + jnp.einsum("cf,bnf->bcn", params["ww"], y) + params["bw"][None, :, None]
    return out.reshape(B, C, H, W).astype(x_nchw.dtype)


def make_params(key, in_ch, num_feats):
    ks = jax.random.split(key, 8)
    s_in = 1.0 / jnp.sqrt(in_ch)
    s_ft = 1.0 / jnp.sqrt(num_feats)
    # PyTorch Conv2d 1x1 layout: weight (out_ch, in_ch), bias (out_ch,).
    return {
        "wt": jax.random.uniform(ks[0], (num_feats, in_ch), jnp.float32, -s_in, s_in),
        "bt": jax.random.uniform(ks[1], (num_feats,), jnp.float32, -s_in, s_in),
        "wp": jax.random.uniform(ks[2], (num_feats, in_ch), jnp.float32, -s_in, s_in),
        "bp": jax.random.uniform(ks[3], (num_feats,), jnp.float32, -s_in, s_in),
        "wg": jax.random.uniform(ks[4], (num_feats, in_ch), jnp.float32, -s_in, s_in),
        "bg": jax.random.uniform(ks[5], (num_feats,), jnp.float32, -s_in, s_in),
        "ww": jax.random.uniform(ks[6], (in_ch, num_feats), jnp.float32, -s_ft, s_ft),
        "bw": jax.random.uniform(ks[7], (in_ch,), jnp.float32, -s_ft, s_ft),
    }


if __name__ == "__main__":
    B, C, H, W = 2, 4, 16, 16
    num_feats = 32

    key = jax.random.PRNGKey(0)
    k_x, k_p = jax.random.split(key)
    x = jax.random.normal(k_x, (B, C, H, W), jnp.float32)
    params = make_params(k_p, C, num_feats)

    # tq/tkv = 128 so the 16x16 demo (N = 256) exercises multi-tile online-softmax
    # accumulation: grid = (2, 2, 2).  Larger inputs auto-pick 256/512 tiles.
    out = nonlocal_pallas(x, params, tq=128, tkv=128)
    out = jax.block_until_ready(out)

    ref = nonlocal_reference(x, params)
    assert out.shape == (B, C, H, W)
    assert jnp.allclose(out, ref, atol=1e-4, rtol=1e-4), "mismatch vs reference"

    print("KERNEL_OK")
</pallas_src>

<mosaic_0001>
module attributes {stable_mosaic.version = 11 : i64} {
  func.func @_nonlocal_flash_kernel(%arg0: i32, %arg1: i32, %arg2: i32, %arg3: memref<1x4x128xf32, #tpu.memory_space<vmem>>, %arg4: memref<1x4x128xf32, #tpu.memory_space<vmem>>, %arg5: memref<32x4xf32, #tpu.memory_space<vmem>>, %arg6: memref<32x1xf32, #tpu.memory_space<vmem>>, %arg7: memref<64x4xf32, #tpu.memory_space<vmem>>, %arg8: memref<64x1xf32, #tpu.memory_space<vmem>>, %arg9: memref<4x32xf32, #tpu.memory_space<vmem>>, %arg10: memref<4x1xf32, #tpu.memory_space<vmem>>, %arg11: memref<1x4x128xf32, #tpu.memory_space<vmem>>, %arg12: memref<128x32xf32, #tpu.memory_space<vmem>>, %arg13: memref<128x1xf32, #tpu.memory_space<vmem>>, %arg14: memref<128x1xf32, #tpu.memory_space<vmem>>, %arg15: memref<128x32xf32, #tpu.memory_space<vmem>>) attributes {dimension_semantics = [#tpu.dimension_semantics<parallel>, #tpu.dimension_semantics<parallel>, #tpu.dimension_semantics<arbitrary>], iteration_bounds = array<i64: 2, 2, 2>, scalar_prefetch = 0 : i64, scratch_operands = 4 : i64, tpu.core_type = #tpu.core_type<tc>, window_params = [{transform_indices = @transform_0, window_bounds = array<i64: 1, 4, 128>}, {transform_indices = @transform_1, window_bounds = array<i64: 1, 4, 128>}, {pipeline_mode = #tpu.pipeline_mode<synchronous>, transform_indices = @transform_2, window_bounds = array<i64: 32, 4>}, {pipeline_mode = #tpu.pipeline_mode<synchronous>, transform_indices = @transform_3, window_bounds = array<i64: 32, 1>}, {pipeline_mode = #tpu.pipeline_mode<synchronous>, transform_indices = @transform_4, window_bounds = array<i64: 64, 4>}, {pipeline_mode = #tpu.pipeline_mode<synchronous>, transform_indices = @transform_5, window_bounds = array<i64: 64, 1>}, {pipeline_mode = #tpu.pipeline_mode<synchronous>, transform_indices = @transform_6, window_bounds = array<i64: 4, 32>}, {pipeline_mode = #tpu.pipeline_mode<synchronous>, transform_indices = @transform_7, window_bounds = array<i64: 4, 1>}, {transform_indices = @transform_8, window_bounds = array<i64: 1, 4, 128>}]} {
    %c0_i32 = arith.constant 0 : i32
    %0 = arith.cmpi eq, %arg2, %c0_i32 : i32
    %1 = arith.extui %0 : i1 to i32
    %c0_i32_0 = arith.constant 0 : i32
    %2 = arith.cmpi ne, %1, %c0_i32_0 : i32
    scf.if %2 {
      %c0_26 = arith.constant 0 : index
      %c0_27 = arith.constant 0 : index
      %c0_28 = arith.constant 0 : index
      %39 = vector.load %arg3[%c0_26, %c0_27, %c0_28] : memref<1x4x128xf32, #tpu.memory_space<vmem>>, vector<1x4x128xf32>
      %40 = vector.shape_cast %39 : vector<1x4x128xf32> to vector<4x128xf32>
      %c0_29 = arith.constant 0 : index
      %c0_30 = arith.constant 0 : index
      %41 = vector.load %arg5[%c0_29, %c0_30] : memref<32x4xf32, #tpu.memory_space<vmem>>, vector<32x4xf32>
      %cst_31 = arith.constant dense<0.000000e+00> : vector<32x128xf32>
      %42 = tpu.matmul %41, %40, %cst_31 {dimension_numbers = #tpu.dot_dimension_numbers<[1], [0], [0], [1], [0, 0, 1, 1], [], []>} : vector<32x4xf32>, vector<4x128xf32>, vector<32x128xf32> -> vector<32x128xf32>
      %c0_32 = arith.constant 0 : index
      %c0_33 = arith.constant 0 : index
      %43 = vector.load %arg6[%c0_32, %c0_33] : memref<32x1xf32, #tpu.memory_space<vmem>>, vector<32x1xf32>
      %44 = vector.broadcast %43 : vector<32x1xf32> to vector<32x128xf32>
      %45 = arith.addf %42, %44 : vector<32x128xf32>
      %46 = tpu.transpose %45, [1, 0] : vector<32x128xf32> -> vector<128x32xf32>
      %c0_34 = arith.constant 0 : index
      %c0_35 = arith.constant 0 : index
      %47 = vector.load %arg12[%c0_34, %c0_35] : memref<128x32xf32, #tpu.memory_space<vmem>>, vector<128x32xf32>
      tpu.vector_store %arg12[%c0_34, %c0_35], %46 {strides = array<i32>} : memref<128x32xf32, #tpu.memory_space<vmem>>, vector<128x32xf32>,
      %cst_36 = arith.constant 0xFF800000 : f32
      %48 = vector.broadcast %cst_36 : f32 to vector<128x1xf32>
      %c0_37 = arith.constant 0 : index
      %c0_38 = arith.constant 0 : index
      %49 = vector.load %arg13[%c0_37, %c0_38] : memref<128x1xf32, #tpu.memory_space<vmem>>, vector<128x1xf32>
      tpu.vector_store %arg13[%c0_37, %c0_38], %48 {strides = array<i32>} : memref<128x1xf32, #tpu.memory_space<vmem>>, vector<128x1xf32>,
      %cst_39 = arith.constant 0.000000e+00 : f32
      %50 = vector.broadcast %cst_39 : f32 to vector<128x1xf32>
      %c0_40 = arith.constant 0 : index
      %c0_41 = arith.constant 0 : index
      %51 = vector.load %arg14[%c0_40, %c0_41] : memref<128x1xf32, #tpu.memory_space<vmem>>, vector<128x1xf32>
      tpu.vector_store %arg14[%c0_40, %c0_41], %50 {strides = array<i32>} : memref<128x1xf32, #tpu.memory_space<vmem>>, vector<128x1xf32>,
      %cst_42 = arith.constant 0.000000e+00 : f32
      %52 = vector.broadcast %cst_42 : f32 to vector<128x32xf32>
      %c0_43 = arith.constant 0 : index
      %c0_44 = arith.constant 0 : index
      %53 = vector.load %arg15[%c0_43, %c0_44] : memref<128x32xf32, #tpu.memory_space<vmem>>, vector<128x32xf32>
      tpu.vector_store %arg15[%c0_43, %c0_44], %52 {strides = array<i32>} : memref<128x32xf32, #tpu.memory_space<vmem>>, vector<128x32xf32>,
    } else {
    }
    %c0 = arith.constant 0 : index
    %c0_1 = arith.constant 0 : index
    %c0_2 = arith.constant 0 : index
    %3 = vector.load %arg4[%c0, %c0_1, %c0_2] : memref<1x4x128xf32, #tpu.memory_space<vmem>>, vector<1x4x128xf32>
    %4 = vector.shape_cast %3 : vector<1x4x128xf32> to vector<4x128xf32>
    %c0_3 = arith.constant 0 : index
    %c0_4 = arith.constant 0 : index
    %5 = vector.load %arg7[%c0_3, %c0_4] : memref<64x4xf32, #tpu.memory_space<vmem>>, vector<64x4xf32>
    %cst = arith.constant dense<0.000000e+00> : vector<64x128xf32>
    %6 = tpu.matmul %5, %4, %cst {dimension_numbers = #tpu.dot_dimension_numbers<[1], [0], [0], [1], [0, 0, 1, 1], [], []>} : vector<64x4xf32>, vector<4x128xf32>, vector<64x128xf32> -> vector<64x128xf32>
    %c0_5 = arith.constant 0 : index
    %c0_6 = arith.constant 0 : index
    %7 = vector.load %arg8[%c0_5, %c0_6] : memref<64x1xf32, #tpu.memory_space<vmem>>, vector<64x1xf32>
    %8 = vector.broadcast %7 : vector<64x1xf32> to vector<64x128xf32>
    %9 = arith.addf %6, %8 : vector<64x128xf32>
    %10 = vector.extract_strided_slice %9 {offsets = [0, 0], sizes = [32, 128], strides = [1, 1]} : vector<64x128xf32> to vector<32x128xf32>
    %11 = vector.extract_strided_slice %9 {offsets = [32, 0], sizes = [32, 128], strides = [1, 1]} : vector<64x128xf32> to vector<32x128xf32>
    %c0_7 = arith.constant 0 : index
    %c0_8 = arith.constant 0 : index
    %12 = vector.load %arg12[%c0_7, %c0_8] : memref<128x32xf32, #tpu.memory_space<vmem>>, vector<128x32xf32>
    %cst_9 = arith.constant dense<0.000000e+00> : vector<128x128xf32>
    %13 = tpu.matmul %12, %10, %cst_9 {dimension_numbers = #tpu.dot_dimension_numbers<[1], [0], [0], [1], [0, 0, 1, 1], [], []>} : vector<128x32xf32>, vector<32x128xf32>, vector<128x128xf32> -> vector<128x128xf32>
    %c0_10 = arith.constant 0 : index
    %c0_11 = arith.constant 0 : index
    %14 = vector.load %arg13[%c0_10, %c0_11] : memref<128x1xf32, #tpu.memory_space<vmem>>, vector<128x1xf32>
    %cst_12 = arith.constant dense<0xFF800000> : vector<128xf32>
    %15 = vector.multi_reduction <maximumf>, %13, %cst_12 [1] : vector<128x128xf32> to vector<128xf32>
    %16 = vector.shape_cast %15 : vector<128xf32> to vector<128x1xf32>
    %17 = arith.maximumf %14, %16 : vector<128x1xf32>
    %18 = arith.subf %14, %17 : vector<128x1xf32>
    %19 = math.exp %18 : vector<128x1xf32>
    %20 = vector.broadcast %17 : vector<128x1xf32> to vector<128x128xf32>
    %21 = arith.subf %13, %20 : vector<128x128xf32>
    %22 = math.exp %21 : vector<128x128xf32>
    %c0_13 = arith.constant 0 : index
    %c0_14 = arith.constant 0 : index
    %23 = vector.load %arg14[%c0_13, %c0_14] : memref<128x1xf32, #tpu.memory_space<vmem>>, vector<128x1xf32>
    %24 = arith.mulf %19, %23 : vector<128x1xf32>
    %cst_15 = arith.constant dense<0.000000e+00> : vector<128xf32>
    %25 = vector.multi_reduction <add>, %22, %cst_15 [1] : vector<128x128xf32> to vector<128xf32>
    %26 = vector.shape_cast %25 : vector<128xf32> to vector<128x1xf32>
    %27 = arith.addf %24, %26 : vector<128x1xf32>
    %c0_16 = arith.constant 0 : index
    %c0_17 = arith.constant 0 : index
    %28 = vector.load %arg14[%c0_16, %c0_17] : memref<128x1xf32, #tpu.memory_space<vmem>>, vector<128x1xf32>
    tpu.vector_store %arg14[%c0_16, %c0_17], %27 {strides = array<i32>} : memref<128x1xf32, #tpu.memory_space<vmem>>, vector<128x1xf32>,
    %cst_18 = arith.constant dense<0.000000e+00> : vector<128x32xf32>
    %29 = tpu.matmul %22, %11, %cst_18 {dimension_numbers = #tpu.dot_dimension_numbers<[1], [1], [0], [0], [0, 0, 1, 0], [], []>} : vector<128x128xf32>, vector<32x128xf32>, vector<128x32xf32> -> vector<128x32xf32>
    %c0_19 = arith.constant 0 : index
    %c0_20 = arith.constant 0 : index
    %30 = vector.load %arg15[%c0_19, %c0_20] : memref<128x32xf32, #tpu.memory_space<vmem>>, vector<128x32xf32>
    %31 = vector.broadcast %19 : vector<128x1xf32> to vector<128x32xf32>
    %32 = arith.mulf %31, %30 : vector<128x32xf32>
    %33 = arith.addf %32, %29 : vector<128x32xf32>
    %c0_21 = arith.constant 0 : index
    %c0_22 = arith.constant 0 : index
    %34 = vector.load %arg15[%c0_21, %c0_22] : memref<128x32xf32, #tpu.memory_space<vmem>>, vector<128x32xf32>
    tpu.vector_store %arg15[%c0_21, %c0_22], %33 {strides = array<i32>} : memref<128x32xf32, #tpu.memory_space<vmem>>, vector<128x32xf32>,
    %c0_23 = arith.constant 0 : index
    %c0_24 = arith.constant 0 : index
    %35 = vector.load %arg13[%c0_23, %c0_24] : memref<128x1xf32, #tpu.memory_space<vmem>>, vector<128x1xf32>
    tpu.vector_store %arg13[%c0_23, %c0_24], %17 {strides = array<i32>} : memref<128x1xf32, #tpu.memory_space<vmem>>, vector<128x1xf32>,
    %c1_i32 = arith.constant 1 : i32
    %36 = arith.cmpi eq, %arg2, %c1_i32 : i32
    %37 = arith.extui %36 : i1 to i32
    %c0_i32_25 = arith.constant 0 : i32
    %38 = arith.cmpi ne, %37, %c0_i32_25 : i32
    scf.if %38 {
      %c0_26 = arith.constant 0 : index
      %c0_27 = arith.constant 0 : index
      %39 = vector.load %arg15[%c0_26, %c0_27] : memref<128x32xf32, #tpu.memory_space<vmem>>, vector<128x32xf32>
      %c0_28 = arith.constant 0 : index
      %c0_29 = arith.constant 0 : index
      %40 = vector.load %arg14[%c0_28, %c0_29] : memref<128x1xf32, #tpu.memory_space<vmem>>, vector<128x1xf32>
      %41 = tpu.reciprocal %40 : vector<128x1xf32> -> vector<128x1xf32>
      %42 = vector.broadcast %41 : vector<128x1xf32> to vector<128x32xf32>
      %43 = arith.mulf %39, %42 : vector<128x32xf32>
      %c0_30 = arith.constant 0 : index
      %c0_31 = arith.constant 0 : index
      %44 = vector.load %arg9[%c0_30, %c0_31] : memref<4x32xf32, #tpu.memory_space<vmem>>, vector<4x32xf32>
      %cst_32 = arith.constant dense<0.000000e+00> : vector<4x128xf32>
      %45 = tpu.matmul %44, %43, %cst_32 {dimension_numbers = #tpu.dot_dimension_numbers<[1], [1], [0], [0], [0, 0, 1, 0], [], []>} : vector<4x32xf32>, vector<128x32xf32>, vector<4x128xf32> -> vector<4x128xf32>
      %c0_33 = arith.constant 0 : index
      %c0_34 = arith.constant 0 : index
      %c0_35 = arith.constant 0 : index
      %46 = vector.load %arg3[%c0_33, %c0_34, %c0_35] : memref<1x4x128xf32, #tpu.memory_space<vmem>>, vector<1x4x128xf32>
      %47 = vector.shape_cast %46 : vector<1x4x128xf32> to vector<4x128xf32>
      %48 = arith.addf %47, %45 : vector<4x128xf32>
      %c0_36 = arith.constant 0 : index
      %c0_37 = arith.constant 0 : index
      %49 = vector.load %arg10[%c0_36, %c0_37] : memref<4x1xf32, #tpu.memory_space<vmem>>, vector<4x1xf32>
      %50 = vector.broadcast %49 : vector<4x1xf32> to vector<4x128xf32>
      %51 = arith.addf %48, %50 : vector<4x128xf32>
      %c0_38 = arith.constant 0 : index
      %c0_39 = arith.constant 0 : index
      %c0_40 = arith.constant 0 : index
      %52 = vector.load %arg11[%c0_38, %c0_39, %c0_40] : memref<1x4x128xf32, #tpu.memory_space<vmem>>, vector<1x4x128xf32>
      %53 = vector.shape_cast %52 : vector<1x4x128xf32> to vector<4x128xf32>
      %54 = vector.shape_cast %51 : vector<4x128xf32> to vector<1x4x128xf32>
      tpu.vector_store %arg11[%c0_38, %c0_39, %c0_40], %54 {strides = array<i32>} : memref<1x4x128xf32, #tpu.memory_space<vmem>>, vector<1x4x128xf32>,
    } else {
    }
    return
  }
  func.func @transform_0(%arg0: i32, %arg1: i32, %arg2: i32) -> (i32, i32, i32) {
    %c0_i32 = arith.constant 0 : i32
    %c0_i32_0 = arith.constant 0 : i32
    return %arg0, %c0_i32, %arg1 : i32, i32, i32
  }
  func.func @transform_1(%arg0: i32, %arg1: i32, %arg2: i32) -> (i32, i32, i32) {
    %c0_i32 = arith.constant 0 : i32
    %c0_i32_0 = arith.constant 0 : i32
    return %arg0, %c0_i32, %arg2 : i32, i32, i32
  }
  func.func @transform_2(%arg0: i32, %arg1: i32, %arg2: i32) -> (i32, i32) {
    %c0_i32 = arith.constant 0 : i32
    %c0_i32_0 = arith.constant 0 : i32
    %c0_i32_1 = arith.constant 0 : i32
    return %c0_i32, %c0_i32_0 : i32, i32
  }
  func.func @transform_3(%arg0: i32, %arg1: i32, %arg2: i32) -> (i32, i32) {
    %c0_i32 = arith.constant 0 : i32
    %c0_i32_0 = arith.constant 0 : i32
    %c0_i32_1 = arith.constant 0 : i32
    return %c0_i32, %c0_i32_0 : i32, i32
  }
  func.func @transform_4(%arg0: i32, %arg1: i32, %arg2: i32) -> (i32, i32) {
    %c0_i32 = arith.constant 0 : i32
    %c0_i32_0 = arith.constant 0 : i32
    %c0_i32_1 = arith.constant 0 : i32
    return %c0_i32, %c0_i32_0 : i32, i32
  }
  func.func @transform_5(%arg0: i32, %arg1: i32, %arg2: i32) -> (i32, i32) {
    %c0_i32 = arith.constant 0 : i32
    %c0_i32_0 = arith.constant 0 : i32
    %c0_i32_1 = arith.constant 0 : i32
    return %c0_i32, %c0_i32_0 : i32, i32
  }
  func.func @transform_6(%arg0: i32, %arg1: i32, %arg2: i32) -> (i32, i32) {
    %c0_i32 = arith.constant 0 : i32
    %c0_i32_0 = arith.constant 0 : i32
    %c0_i32_1 = arith.constant 0 : i32
    return %c0_i32, %c0_i32_0 : i32, i32
  }
  func.func @transform_7(%arg0: i32, %arg1: i32, %arg2: i32) -> (i32, i32) {
    %c0_i32 = arith.constant 0 : i32
    %c0_i32_0 = arith.constant 0 : i32
    %c0_i32_1 = arith.constant 0 : i32
    return %c0_i32, %c0_i32_0 : i32, i32
  }
  func.func @transform_8(%arg0: i32, %arg1: i32, %arg2: i32) -> (i32, i32, i32) {
    %c0_i32 = arith.constant 0 : i32
    %c0_i32_0 = arith.constant 0 : i32
    return %arg0, %c0_i32, %arg1 : i32, i32, i32
  }
}

</mosaic_0001>

<bundles_post_ra>
// kernel: tpu_custom_call.1
= control target key start
LH: loop header
LB: loop body
LE: loop exit
PB: predicated region body
PF: predicated region fallthrough
CT: control target
= control target key end

     0   :  { %13 = vsyncpa [#allocation7], 0  ;;  %s3369_s0 = inlined_call_operand.vmem [shape: f32[2,4,256], index: 0, kind: input, shape index: {}]   ;;  %s3370_s1 = inlined_call_operand.vmem [shape: f32[2,4,256], index: 1, kind: input, shape index: {}]   ;;  %s3371_s2 = inlined_call_operand.vmem [shape: f32[32,4], index: 2, kind: input, shape index: {}]   ;;  %s3372_s3 = inlined_call_operand.vmem [shape: f32[32,1], index: 3, kind: input, shape index: {}]   ;;  %s3373_s4 = inlined_call_operand.vmem [shape: f32[64,4], index: 4, kind: input, shape index: {}]   ;;  %s3374_s5 = inlined_call_operand.vmem [shape: f32[64,1], index: 5, kind: input, shape index: {}]   ;;  %s3375_s6 = inlined_call_operand.vmem [shape: f32[4,32], index: 6, kind: input, shape index: {}]   ;;  %s3376_s7 = inlined_call_operand.vmem [shape: f32[4,1], index: 7, kind: input, shape index: {}]   ;;  %s3377_s8 = inlined_call_operand.hbm [shape: f32[2,4,256], index: 8, kind: output, shape index: {}]  }
   0x1   :  { %15 = vsyncpa [#allocation7 + $0x1], 0  ;;  %s2666_s27 = smov 0   ;;  %s2668_s28 = smov 0  }
   0x2   :  { %s2670_s29 = smov 0   ;;  %s2672_s30 = smov 0  }
   0x3   :  { %s2674_s9 = smov 0   ;;  %s2676_s10 = smov 0  }
   0x4   :  { %s2678_s11 = smov 0   ;;  %s2680_s12 = smov 0  }
   0x5   :  { %s2682_s13 = smov 0   ;;  %s2684_s14 = smov 0  }
   0x6 LB: > { %3387 = sst [smem:[#allocation9_spill]] %s2575_s27  ;;  %s2041_s15 = sadd.s32 4294967295, %s2611_s14   ;;  %s2611_s14 = sphi %s2684_s14, %s21_s14   ;;  %s2607_s13 = sphi %s2682_s13, %s3409_s13   ;;  %s2603_s12 = sphi %s2680_s12, %s3408_s12   ;;  %s2599_s11 = sphi %s2678_s11, %s3407_s11   ;;  %s2595_s10 = sphi %s2676_s10, %s3406_s10   ;;  %s2591_s9 = sphi %s2674_s9, %s3405_s9   ;;  %s2587_s30 = sphi %s2672_s30, %s3404_s30   ;;  %s2583_s29 = sphi %s2670_s29, %s3412_s29   ;;  %s2579_s28 = sphi %s2668_s28, %s3411_s28   ;;  %s2575_s27 = sphi %s2666_s27, %s3410_s27  }
   0x7   : > { %3388 = sst [smem:[#allocation10_spill]] %s2583_s29  ;;  %s2042_s16 = sadd.s32 4294967294, %s2611_s14  }
   0x8   : > { %3389 = sst [smem:[#allocation11_spill]] %s2599_s11  ;;  %s33_s17 = sadd.s32 1, %s2599_s11 }
   0x9   : > { %3390 = sst [smem:[#allocation12_spill]] %s2603_s12  ;;  %p34_p0 = scmp.ge.s32.totalorder %s33_s17, 2 }
   0xa   : > { %3391 = sst [smem:[#allocation13_spill]] %s2607_s13  ;;  %s36_s18 = sadd.s32 1, %s2603_s12 }
   0xb   : > { %s40_s19 = sadd.s32 1, %s2607_s13  ;;  %p241_p1 = scmp.ne.s32.totalorder %s2583_s29, %s2579_s28 }
   0xc   : > { %s3414_s17 = smov (%p34_p0, %s33_s17), 0  ;;  %s3416_s18 = smov (!%p34_p0, %s36_s18), %s2603_s12 }
   0xd   : > { %3392 = sst [smem:[#allocation14_spill]] %s3414_s17  ;;  %p242_p2 = scmp.eq.s32.totalorder %s2041_s15, 7 }
   0xe   : > { %p247_p3 = scmp.ne.s32.totalorder %s2579_s28, %s2575_s27  ;;  %p38_p4 = scmp.ge.s32.totalorder %s3416_s18, 2 }
   0xf   : > { %p248_p5 = scmp.eq.s32.totalorder %s2042_s16, 7  ;;  %p2728_p6 = por %p242_p2, %p241_p1 }
  0x10   : > { %s3418_s18 = smov (%p38_p4, %s3416_s18), 0  ;;  %s3420_s19 = smov (!%p38_p4, %s40_s19), %s2607_s13 }
  0x11   : > { %3394 = sst [smem:[#allocation15_spill]] %s3418_s18  ;;  %p2735_p7 = por %p248_p5, %p247_p3 }
  0x12   : > { %p2045_p8 = scmp.ge.s32.totalorder %s2611_s14, 1  ;;  %p42_p9 = scmp.ge.s32.totalorder %s3420_s19, 2 }
  0x13   : > { %s3395_s21 = scalar_select %p2735_p7, 1, 0 }
  0x14   : > { %p306_p10 = scmp.lt.s32.totalorder %s2611_s14, 9  ;;  %s227_s22 = ssub.s32 %s2603_s12, %s3418_s18 }
  0x15   : > { %3396 = sst [smem:[#allocation16_spill]] %s3395_s21  ;;  %s3422_s19 = smov (%p42_p9, %s3420_s19), 0 }
  0x16   : > { %3397 = sst [smem:[#allocation17_spill]] %s3422_s19  ;;  %p307_p11 = pnand %p2045_p8, %p306_p10 }
  0x17   : > { %s226_s23 = ssub.s32 %s2607_s13, %s3422_s19  ;;  %s231_s25 = sadd.s32 1, %s2583_s29 }
  0x18   : > { %s228_s24 = sor.u32 %s227_s22, %s226_s23  ;;  %s3385_s15 = sand.u32 (!%p307_p11), 1, %s2579_s28  }
  0x19   : > { %p229_p12 = scmp.eq.s32.totalorder %s228_s24, 0  ;;  %310 = sbr.rel (%p307_p11) target bundleno = 1778 (0x6f2), region = 52 }
  0x1a   : > { %p351_p13 = scmp.lt.s32.totalorder (!%p307_p11), %s2595_s10, 1  ;;  %s2755_s16 = sshll.u32 (!%p307_p11), %s3385_s15, 2 }
  0x1b   : > { %s2749_s26 = scalar_select %p229_p12, %s2583_s29, %s231_s25  }
  0x1c   : > { %p353_p0 = scmp.lt.s32.totalorder (!%p307_p11), %s2591_s9, 1  ;;  %p361_p1 = scmp.lt.s32.totalorder (!%p307_p11), %s2587_s30, 1 }
  0x1d   : > { %3398 = sst [smem:[#allocation18_spill]] %s2749_s26  ;;  %s350_s27 = scalar_lea.vmem (!%p307_p11), [#allocation6], %s2755_s16 }
  0x1e   : > { %s352_s22 = scalar_select %p351_p13, %s2595_s10, 1 }
  0x1f   : > { %s354_s23 = scalar_select %p353_p0, %s2591_s9, 1 }
  0x20   : > { %s2047_s24 = sshll.u32 %s352_s22, 1  ;;  %p2051_p2 = scmp.ne.s32.totalorder %s2587_s30, 0 }
  0x21   : > { %s356_s25 = sadd.s32 %s2047_s24, %s354_s23 }
  0x22   : > { %s2048_s19 = sshll.u32 %s356_s25, 2 }
  0x23   : > { %s2764_s13 = scalar_lea.vmem %s3369_s0, %s2048_s19 }
  0x24   : > { %s362_s12 = scalar_select %p361_p1, %s2587_s30, 1 }
  0x25   : > { %370 = sbr.rel (%p2051_p2) target bundleno = 428 (0x1ac), region = 56 }
  0x26   : > { %s364_s11 = sadd.s32 %s2047_s24, %s362_s12 }
  0x27   : > { %s2050_s26 = sshll.u32 %s364_s11, 2 }
  0x28   : > { %s2770_s15 = scalar_lea.vmem %s3370_s1, %s2050_s26 }
  0x2a   : > { %v371_v0 = vld [vmem:[%s2764_s13] sm:$0xf]  ;;  %vm413_vm0 = vcmask 1043456   ;;  %vm400_vm1 = vcmask 31744   ;;  %v373_v2 = vld [vmem:[%s3371_s2 + $0x8] sm:$0xff]  ;;  %v374_v3 = vld [vmem:[%s3371_s2 + $0x10] sm:$0xff] }
  0x2b   : > { %v372_v1 = vld [vmem:[%s3371_s2] sm:$0xff]  ;;  %2176 = vmatprep.subr.msk.mxu0 %vm413_vm0, %v371_v0  ;;  %2297 = vmatprep.subr.msk.mxu1 %vm413_vm0, %v371_v0  ;;  %v375_v4 = vld [vmem:[%s3371_s2 + $0x18] sm:$0xff]  ;;  %v2613_v6 = vmov 0   ;;  %v378_v7 = vld [vmem:[%s3372_s3 + $0x10] sm:$0xff]  ;;  %vm534_vm2 = vcmask 261120   ;;  %vm551_vm3 = vcmask 7168  }
  0x2c   : > { %2178 = vmatprep.mubr.msk.f32.mxu0 %vm400_vm1, %v372_v1  ;;  %2177 = vmatpush3.msk.msra.mxu0 %vm413_vm0, %v371_v0  ;;  %v376_v5 = vld [vmem:[%s3372_s3] sm:$0xff]  ;;  %v377_v8 = vld [vmem:[%s3372_s3 + $0x8] sm:$0xff]  ;;  %v379_v9 = vld [vmem:[%s3372_s3 + $0x18] sm:$0xff]  ;;  %v2614_v10 = vmov -inf   ;;  %v2615_v11 = vmov 0.0  }
  0x2d   : > { %2179 = vmatmul.mubr.msk.f32.vlgmr.msra.gmra.mxu0 %vm400_vm1, %v373_v2  ;;  %2298 = vmatpush3.msk.msra.mxu1 %vm413_vm0, %v371_v0  ;;  %552 = vst.msk [vmem:[#allocation3] sm:$0xff] %vm551_vm3, %v2614_v10  ;;  %553 = vst.msk [vmem:[#allocation3 + $0x8] sm:$0xff] %vm551_vm3, %v2614_v10 }
  0x2e   : > { %2181 = vmatprep.mubr.msk.f32.mxu1 %vm400_vm1, %v374_v3  ;;  %2401 = vset.pattern.permute.xlu0 %v2613_v6  ;;  %554 = vst.msk [vmem:[#allocation3 + $0x10] sm:$0xff] %vm551_vm3, %v2614_v10  ;;  %555 = vst.msk [vmem:[#allocation3 + $0x18] sm:$0xff] %vm551_vm3, %v2614_v10 }
  0x2f   : > { %2182 = vmatmul.mubr.msk.f32.vlgmr.msra.gmra.mxu1 %vm400_vm1, %v375_v4  ;;  %382 = vperm.xlu0 %2401, %v376_v5   ;;  %556 = vst.msk [vmem:[#allocation3 + $0x20] sm:$0xff] %vm551_vm3, %v2614_v10  ;;  %557 = vst.msk [vmem:[#allocation3 + $0x28] sm:$0xff] %vm551_vm3, %v2614_v10 }
  0x30   : > { %2402 = vset.pattern.permute.xlu1 %v2613_v6  ;;  %558 = vst.msk [vmem:[#allocation3 + $0x30] sm:$0xff] %vm551_vm3, %v2614_v10  ;;  %559 = vst.msk [vmem:[#allocation3 + $0x38] sm:$0xff] %vm551_vm3, %v2614_v10 }
  0x31   : > { %392 = vperm.xlu1 %2402, %v378_v7   ;;  %560 = vst.msk [vmem:[#allocation3 + $0x40] sm:$0xff] %vm551_vm3, %v2614_v10  ;;  %561 = vst.msk [vmem:[#allocation3 + $0x48] sm:$0xff] %vm551_vm3, %v2614_v10 }
  0x32   : > { %562 = vst.msk [vmem:[#allocation3 + $0x50] sm:$0xff] %vm551_vm3, %v2614_v10  ;;  %563 = vst.msk [vmem:[#allocation3 + $0x58] sm:$0xff] %vm551_vm3, %v2614_v10 }
  0x33   : > { %387 = vperm.xlu0 %2401, %v377_v8   ;;  %564 = vst.msk [vmem:[#allocation3 + $0x60] sm:$0xff] %vm551_vm3, %v2614_v10  ;;  %565 = vst.msk [vmem:[#allocation3 + $0x68] sm:$0xff] %vm551_vm3, %v2614_v10 }
  0x34   : > { %566 = vst.msk [vmem:[#allocation3 + $0x70] sm:$0xff] %vm551_vm3, %v2614_v10  ;;  %567 = vst.msk [vmem:[#allocation3 + $0x78] sm:$0xff] %vm551_vm3, %v2614_v10 }
  0x35   : > { %397 = vperm.xlu1 %2402, %v379_v9   ;;  %568 = vst.msk [vmem:[#allocation4] sm:$0xff] %vm551_vm3, %v2615_v11  ;;  %569 = vst.msk [vmem:[#allocation4 + $0x8] sm:$0xff] %vm551_vm3, %v2615_v11 }
  0x36   : > { %570 = vst.msk [vmem:[#allocation4 + $0x10] sm:$0xff] %vm551_vm3, %v2615_v11  ;;  %571 = vst.msk [vmem:[#allocation4 + $0x18] sm:$0xff] %vm551_vm3, %v2615_v11 }
  0x37   : > { %572 = vst.msk [vmem:[#allocation4 + $0x20] sm:$0xff] %vm551_vm3, %v2615_v11  ;;  %573 = vst.msk [vmem:[#allocation4 + $0x28] sm:$0xff] %vm551_vm3, %v2615_v11 }
  0x38   : > { %574 = vst.msk [vmem:[#allocation4 + $0x30] sm:$0xff] %vm551_vm3, %v2615_v11  ;;  %575 = vst.msk [vmem:[#allocation4 + $0x38] sm:$0xff] %vm551_vm3, %v2615_v11 }
  0x39   : > { %576 = vst.msk [vmem:[#allocation4 + $0x40] sm:$0xff] %vm551_vm3, %v2615_v11  ;;  %577 = vst.msk [vmem:[#allocation4 + $0x48] sm:$0xff] %vm551_vm3, %v2615_v11 }
  0x3a   : > { %578 = vst.msk [vmem:[#allocation4 + $0x50] sm:$0xff] %vm551_vm3, %v2615_v11  ;;  %579 = vst.msk [vmem:[#allocation4 + $0x58] sm:$0xff] %vm551_vm3, %v2615_v11 }
  0x3b   : > { %580 = vst.msk [vmem:[#allocation4 + $0x60] sm:$0xff] %vm551_vm3, %v2615_v11  ;;  %581 = vst.msk [vmem:[#allocation4 + $0x68] sm:$0xff] %vm551_vm3, %v2615_v11 }
  0x3c   : > { %582 = vst.msk [vmem:[#allocation4 + $0x70] sm:$0xff] %vm551_vm3, %v2615_v11  ;;  %583 = vst.msk [vmem:[#allocation4 + $0x78] sm:$0xff] %vm551_vm3, %v2615_v11 }
  0x3d   : > { %584 = vst.msk [vmem:[#allocation5] sm:$0xff] %vm534_vm2, %v2615_v11  ;;  %585 = vst.msk [vmem:[#allocation5 + $0x8] sm:$0xff] %vm534_vm2, %v2615_v11 }
  0x3e   : > { %586 = vst.msk [vmem:[#allocation5 + $0x10] sm:$0xff] %vm534_vm2, %v2615_v11  ;;  %587 = vst.msk [vmem:[#allocation5 + $0x18] sm:$0xff] %vm534_vm2, %v2615_v11 }
  0x3f   : > { %588 = vst.msk [vmem:[#allocation5 + $0x20] sm:$0xff] %vm534_vm2, %v2615_v11  ;;  %589 = vst.msk [vmem:[#allocation5 + $0x28] sm:$0xff] %vm534_vm2, %v2615_v11 }
  0x40   : > { %590 = vst.msk [vmem:[#allocation5 + $0x30] sm:$0xff] %vm534_vm2, %v2615_v11  ;;  %591 = vst.msk [vmem:[#allocation5 + $0x38] sm:$0xff] %vm534_vm2, %v2615_v11 }
  0x41   : > { %592 = vst.msk [vmem:[#allocation5 + $0x40] sm:$0xff] %vm534_vm2, %v2615_v11  ;;  %593 = vst.msk [vmem:[#allocation5 + $0x48] sm:$0xff] %vm534_vm2, %v2615_v11 }
  0x42   : > { %594 = vst.msk [vmem:[#allocation5 + $0x50] sm:$0xff] %vm534_vm2, %v2615_v11  ;;  %595 = vst.msk [vmem:[#allocation5 + $0x58] sm:$0xff] %vm534_vm2, %v2615_v11 }
  0x43   : > { %596 = vst.msk [vmem:[#allocation5 + $0x60] sm:$0xff] %vm534_vm2, %v2615_v11  ;;  %597 = vst.msk [vmem:[#allocation5 + $0x68] sm:$0xff] %vm534_vm2, %v2615_v11 }
  0x44   : > { %598 = vst.msk [vmem:[#allocation5 + $0x70] sm:$0xff] %vm534_vm2, %v2615_v11  ;;  %599 = vst.msk [vmem:[#allocation5 + $0x78] sm:$0xff] %vm534_vm2, %v2615_v11 }
  0xaa   : > { %v383_v12 = vpop.permute.xlu0 %382 }
  0xac   : > { %v393_v18 = vpop.permute.xlu1 %392 }
  0xae   : > { %v388_v16 = vpop.permute.xlu0 %387 }
  0xb0   : > { %v398_v22 = vpop.permute.xlu1 %397 }
  0xed   : > { %v2180_v13 = vpop.f32.mrf.mxu0 }
  0xee   : > { %v489_v19 = vadd.f32 %v2180_v13, %v388_v16 }
  0xef   : > { %v483_v14 = vpop.f32.mrf.mxu0  ;;  %v2183_v17 = vpop.f32.mrf.mxu1 }
  0xf0   : > { %v484_v15 = vadd.f32 %v483_v14, %v383_v12  ;;  %v499_v23 = vadd.f32 %v2183_v17, %v398_v22 }
  0xf1   : > { %v493_v20 = vpop.f32.mrf.mxu1 }
  0xf2   : > { %502 = vxpose.xlu0.b32.start [1/4] (short) %v484_v15, 128  ;;  %v494_v21 = vadd.f32 %v493_v20, %v393_v18 }
  0xf6   : > { %503 = vxpose.xlu0.b32.cont [2/4] (short) %v489_v19, 128 }
  0xfa   : > { %504 = vxpose.xlu0.b32.cont [3/4] (short) %v494_v21, 128 }
  0xfe   : > { %505 = vxpose.xlu0.b32.end [4/4] (short) %v499_v23, 128 }
 0x16e   : > { %v518_v24 = vpop.trf.xlu0 }
 0x16f   : > { %535 = vst.msk [vmem:[#allocation2] sm:$0xff] %vm534_vm2, %v518_v24 }
 0x172   : > { %v519_v25 = vpop.trf.xlu0 }
 0x173   : > { %536 = vst.msk [vmem:[#allocation2 + $0x8] sm:$0xff] %vm534_vm2, %v519_v25 }
 0x176   : > { %v520_v26 = vpop.trf.xlu0 }
 0x177   : > { %537 = vst.msk [vmem:[#allocation2 + $0x10] sm:$0xff] %vm534_vm2, %v520_v26 }
 0x17a   : > { %v521_v27 = vpop.trf.xlu0 }
 0x17b   : > { %538 = vst.msk [vmem:[#allocation2 + $0x18] sm:$0xff] %vm534_vm2, %v521_v27 }
 0x17e   : > { %v522_v28 = vpop.trf.xlu0 }
 0x17f   : > { %539 = vst.msk [vmem:[#allocation2 + $0x20] sm:$0xff] %vm534_vm2, %v522_v28 }
 0x182   : > { %v523_v29 = vpop.trf.xlu0 }
 0x183   : > { %540 = vst.msk [vmem:[#allocation2 + $0x28] sm:$0xff] %vm534_vm2, %v523_v29 }
 0x186   : > { %v524_v30 = vpop.trf.xlu0 }
 0x187   : > { %541 = vst.msk [vmem:[#allocation2 + $0x30] sm:$0xff] %vm534_vm2, %v524_v30 }
 0x18a   : > { %v525_v31 = vpop.trf.xlu0 }
 0x18b   : > { %542 = vst.msk [vmem:[#allocation2 + $0x38] sm:$0xff] %vm534_vm2, %v525_v31 }
 0x18e   : > { %v526_v32 = vpop.trf.xlu0 }
 0x18f   : > { %543 = vst.msk [vmem:[#allocation2 + $0x40] sm:$0xff] %vm534_vm2, %v526_v32 }
 0x192   : > { %v527_v33 = vpop.trf.xlu0 }
 0x193   : > { %544 = vst.msk [vmem:[#allocation2 + $0x48] sm:$0xff] %vm534_vm2, %v527_v33 }
 0x196   : > { %v528_v34 = vpop.trf.xlu0 }
 0x197   : > { %545 = vst.msk [vmem:[#allocation2 + $0x50] sm:$0xff] %vm534_vm2, %v528_v34 }
 0x19a   : > { %v529_v35 = vpop.trf.xlu0 }
 0x19b   : > { %546 = vst.msk [vmem:[#allocation2 + $0x58] sm:$0xff] %vm534_vm2, %v529_v35 }
 0x19e   : > { %v530_v36 = vpop.trf.xlu0 }
 0x19f   : > { %547 = vst.msk [vmem:[#allocation2 + $0x60] sm:$0xff] %vm534_vm2, %v530_v36 }
 0x1a2   : > { %v531_v37 = vpop.trf.xlu0 }
 0x1a3   : > { %548 = vst.msk [vmem:[#allocation2 + $0x68] sm:$0xff] %vm534_vm2, %v531_v37 }
 0x1a6   : > { %v532_v38 = vpop.trf.xlu0 }
 0x1a7   : > { %549 = vst.msk [vmem:[#allocation2 + $0x70] sm:$0xff] %vm534_vm2, %v532_v38 }
 0x1aa   : > { %v533_v39 = vpop.trf.xlu0 }
 0x1ab   : > { %550 = vst.msk [vmem:[#allocation2 + $0x78] sm:$0xff] %vm534_vm2, %v533_v39 }
 0x1ac PF: > { %v600_v40 = vld [vmem:[%s2770_s15] sm:$0xf]  ;;  %vm682_vm4 = vcmask 1043456   ;;  %vm657_vm5 = vcmask 31744   ;;  %v602_v42 = vld [vmem:[%s3373_s4 + $0x8] sm:$0xff]  ;;  %v603_v43 = vld [vmem:[%s3373_s4 + $0x10] sm:$0xff] }
 0x1ad   : > { %v601_v41 = vld [vmem:[%s3373_s4] sm:$0xff]  ;;  %2184 = vmatprep.subr.msk.mxu0 %vm682_vm4, %v600_v40  ;;  %v612_v44 = vld [vmem:[%s3374_s5 + $0x18] sm:$0xff]  ;;  %v2616_v45 = vmov 0   ;;  %v610_v46 = vld [vmem:[%s3374_s5 + $0x8] sm:$0xff]  ;;  %vm807_vm6 = vcmask 261120   ;;  %vm1321_vm7 = vcmask 7168  }
 0x1ae   : > { %2186 = vmatprep.mubr.msk.f32.mxu0 %vm657_vm5, %v601_v41  ;;  %2185 = vmatpush3.msk.msra.mxu0 %vm682_vm4, %v600_v40  ;;  %v604_v47 = vld [vmem:[%s3373_s4 + $0x18] sm:$0xff]  ;;  %v611_v48 = vld [vmem:[%s3374_s5 + $0x10] sm:$0xff]  ;;  %v609_v49 = vld [vmem:[%s3374_s5] sm:$0xff]  ;;  %p2082_p3 = scmp.ne.s32.totalorder %s2587_s30, 1 }
 0x1af   : > { %2404 = vset.pattern.permute.xlu1 %v2616_v45  ;;  %2187 = vmatmul.mubr.msk.f32.vlgmr.msra.gmra.mxu0 %vm657_vm5, %v602_v42  ;;  %v791_v50 = vld [vmem:[#allocation2] sm:$0xff]  ;;  %v606_v52 = vld [vmem:[%s3373_s4 + $0x28] sm:$0xff]  ;;  %v607_v53 = vld [vmem:[%s3373_s4 + $0x30] sm:$0xff] }
 0x1b0   : > { %2403 = vset.pattern.permute.xlu0 %v2616_v45  ;;  %2189 = vmatprep.mubr.msk.f32.mxu0 %vm657_vm5, %v603_v43  ;;  %v605_v51 = vld [vmem:[%s3373_s4 + $0x20] sm:$0xff]  ;;  %v608_v54 = vld [vmem:[%s3373_s4 + $0x38] sm:$0xff]  ;;  %v792_v3 = vld [vmem:[#allocation2 + $0x8] sm:$0xff] }
 0x1b1   : > { %634 = vperm.xlu0 %2403, %v612_v44   ;;  %624 = vperm.xlu1 %2404, %v610_v46   ;;  %v793_v4 = vld [vmem:[#allocation2 + $0x10] sm:$0xff]  ;;  %v794_v5 = vld [vmem:[#allocation2 + $0x18] sm:$0xff]  ;;  %v795_v6 = vld [vmem:[#allocation2 + $0x20] sm:$0xff] }
 0x1b2   : > { %2206 = vmatprep.mubr.msk.f32.mxu1 %vm807_vm6, %v791_v50  ;;  %v796_v7 = vld [vmem:[#allocation2 + $0x28] sm:$0xff]  ;;  %v797_v8 = vld [vmem:[#allocation2 + $0x30] sm:$0xff]  ;;  %v798_v9 = vld [vmem:[#allocation2 + $0x38] sm:$0xff] }
 0x1b3   : > { %2190 = vmatmul.mubr.msk.f32.gmra.mxu0 %vm657_vm5, %v604_v47  ;;  %v799_v10 = vld [vmem:[#allocation2 + $0x40] sm:$0xff]  ;;  %v800_v11 = vld [vmem:[#allocation2 + $0x48] sm:$0xff]  ;;  %v801_v12 = vld [vmem:[#allocation2 + $0x50] sm:$0xff] }
 0x1b4   : > { %2192 = vmatprep.mubr.msk.f32.mxu0 %vm657_vm5, %v605_v51  ;;  %v802_v13 = vld [vmem:[#allocation2 + $0x58] sm:$0xff]  ;;  %v803_v14 = vld [vmem:[#allocation2 + $0x60] sm:$0xff]  ;;  %v804_v15 = vld [vmem:[#allocation2 + $0x68] sm:$0xff] }
 0x1b5   : > { %629 = vperm.xlu0 %2403, %v611_v48   ;;  %619 = vperm.xlu1 %2404, %v609_v49   ;;  %v805_v16 = vld [vmem:[#allocation2 + $0x70] sm:$0xff]  ;;  %v806_v17 = vld [vmem:[#allocation2 + $0x78] sm:$0xff]  ;;  %v614_v34 = vld [vmem:[%s3374_s5 + $0x28] sm:$0xff] }
 0x1b6   : > { %v616_v35 = vld [vmem:[%s3374_s5 + $0x38] sm:$0xff]  ;;  %v615_v36 = vld [vmem:[%s3374_s5 + $0x30] sm:$0xff]  ;;  %v1002_v37 = vld [vmem:[#allocation3 + $0x8] sm:$0xff] }
 0x1b7   : > { %2193 = vmatmul.mubr.msk.f32.gmra.mxu0 %vm657_vm5, %v606_v52  ;;  %v1001_v39 = vld [vmem:[#allocation3] sm:$0xff]  ;;  %v2982_v43 = vld [vmem:[#allocation3 + $0x18] sm:$0xff]  ;;  %v1003_v46 = vld [vmem:[#allocation3 + $0x10] sm:$0xff] }
 0x1b8   : > { %2195 = vmatprep.mubr.msk.f32.mxu0 %vm657_vm5, %v607_v53  ;;  %v2988_v47 = vld [vmem:[#allocation3 + $0x20] sm:$0xff]  ;;  %v2994_v52 = vld [vmem:[#allocation3 + $0x28] sm:$0xff]  ;;  %v2996_v53 = vld [vmem:[#allocation3 + $0x30] sm:$0xff] }
 0x1bb   : > { %2196 = vmatmul.mubr.msk.f32.gmra.mxu0 %vm657_vm5, %v608_v54 }
 0x22c   : > { %v635_v55 = vpop.permute.xlu0 %634  ;;  %v625_v57 = vpop.permute.xlu1 %624 }
 0x230   : > { %v630_v61 = vpop.permute.xlu0 %629  ;;  %v620_v0 = vpop.permute.xlu1 %619 }
 0x26f   : > { %v2188_v56 = vpop.f32.mrf.mxu0 }
 0x270   : > { %v758_v1 = vadd.f32 %v2188_v56, %v625_v57 }
 0x271   : > { %v752_v58 = vpop.f32.mrf.mxu0 }
 0x272   : > { %v753_v2 = vadd.f32 %v752_v58, %v620_v0  ;;  %v3006_v58 = vld [vmem:[#allocation3 + $0x38] sm:$0xff]  ;;  %v3021_v0 = vld [vmem:[#allocation3 + $0x48] sm:$0xff] }
 0x273   : > { %v2191_v59 = vpop.f32.mrf.mxu0 }
 0x274   : > { %v768_v60 = vadd.f32 %v2191_v59, %v635_v55  ;;  %v3008_v59 = vld [vmem:[#allocation3 + $0x40] sm:$0xff] }
 0x275   : > { %v762_v62 = vpop.f32.mrf.mxu0 }
 0x276   : > { %v763_v63 = vadd.f32 %v762_v62, %v630_v61  ;;  %2198 = vmatprep.subr.mxu1 %v768_v60 }
 0x277   : > { %2199 = vmatpush3.msra.mxu1 %v768_v60 }
 0x278   : > { %2200 = vmatprep.subr.mxu1 %v763_v63 }
 0x279   : > { %2201 = vmatpush3.msra.mxu1 %v763_v63 }
 0x27a   : > { %2202 = vmatprep.subr.mxu1 %v758_v1 }
 0x27b   : > { %2203 = vmatpush3.msra.mxu1 %v758_v1  ;;  %v3023_v1 = vld [vmem:[#allocation3 + $0x50] sm:$0xff] }
 0x27c   : > { %2204 = vmatprep.subr.mxu1 %v753_v2 }
 0x27d   : > { %2205 = vmatpush3.msra.mxu1 %v753_v2 }
 0x27e   : > { %2207 = vmatmul.mubr.msk.f32.vlgmr.msra.gmra.mxu1 %vm807_vm6, %v792_v3 }
 0x27f   : > { %2209 = vmatprep.mubr.msk.f32.mxu1 %vm807_vm6, %v793_v4 }
 0x282   : > { %2210 = vmatmul.mubr.msk.f32.gmra.mxu1 %vm807_vm6, %v794_v5 }
 0x283   : > { %2212 = vmatprep.mubr.msk.f32.mxu1 %vm807_vm6, %v795_v6  ;;  %v613_v6 = vld [vmem:[%s3374_s5 + $0x20] sm:$0xff] }
 0x286   : > { %2213 = vmatmul.mubr.msk.f32.gmra.mxu1 %vm807_vm6, %v796_v7 }
 0x287   : > { %2215 = vmatprep.mubr.msk.f32.mxu1 %vm807_vm6, %v797_v8 }
 0x28a   : > { %2216 = vmatmul.mubr.msk.f32.gmra.mxu1 %vm807_vm6, %v798_v9  ;;  %v3039_v9 = vld [vmem:[#allocation3 + $0x58] sm:$0xff] }
 0x28b   : > { %2218 = vmatprep.mubr.msk.f32.mxu1 %vm807_vm6, %v799_v10  ;;  %v3041_v10 = vld [vmem:[#allocation3 + $0x68] sm:$0xff] }
 0x28e   : > { %2219 = vmatmul.mubr.msk.f32.gmra.mxu1 %vm807_vm6, %v800_v11 }
 0x28f   : > { %2221 = vmatprep.mubr.msk.f32.mxu1 %vm807_vm6, %v801_v12 }
 0x292   : > { %2222 = vmatmul.mubr.msk.f32.gmra.mxu1 %vm807_vm6, %v802_v13 }
 0x293   : > { %2224 = vmatprep.mubr.msk.f32.mxu1 %vm807_vm6, %v803_v14 }
 0x296   : > { %2225 = vmatmul.mubr.msk.f32.gmra.mxu1 %vm807_vm6, %v804_v15 }
 0x297   : > { %2227 = vmatprep.mubr.msk.f32.mxu1 %vm807_vm6, %v805_v16 }
 0x29a   : > { %2228 = vmatmul.mubr.msk.f32.gmra.mxu1 %vm807_vm6, %v806_v17 }
 0x33e   : > { %v2924_v18 = vpop.f32.mrf.mxu1 }
 0x33f   : > { %1019 = vmax.xlane.f32.xlu1 %v2924_v18 }
 0x340   : > { %v2927_v19 = vpop.f32.mrf.mxu1 }
 0x341   : > { %1017 = vmax.xlane.f32.xlu0 %v2927_v19 }
 0x342   : > { %v2930_v20 = vpop.f32.mrf.mxu1 }
 0x344   : > { %v2932_v21 = vpop.f32.mrf.mxu1 }
 0x345   : > { %1023 = vmax.xlane.f32.xlu0 %v2930_v20 }
 0x346   : > { %v2935_v22 = vpop.f32.mrf.mxu1 }
 0x348   : > { %v2937_v23 = vpop.f32.mrf.mxu1 }
 0x349   : > { %1021 = vmax.xlane.f32.xlu0 %v2932_v21  ;;  %1025 = vmax.xlane.f32.xlu1 %v2937_v23 }
 0x34a   : > { %v2941_v24 = vpop.f32.mrf.mxu1 }
 0x34c   : > { %v2943_v25 = vpop.f32.mrf.mxu1 }
 0x34d   : > { %1027 = vmax.xlane.f32.xlu0 %v2935_v22  ;;  %1029 = vmax.xlane.f32.xlu1 %v2943_v25 }
 0x34e   : > { %v2947_v26 = vpop.f32.mrf.mxu1 }
 0x350   : > { %v2949_v27 = vpop.f32.mrf.mxu1 }
 0x351   : > { %1031 = vmax.xlane.f32.xlu0 %v2941_v24  ;;  %1033 = vmax.xlane.f32.xlu1 %v2949_v27 }
 0x352   : > { %v2953_v28 = vpop.f32.mrf.mxu1 }
 0x354   : > { %v2955_v29 = vpop.f32.mrf.mxu1 }
 0x355   : > { %1035 = vmax.xlane.f32.xlu0 %v2947_v26  ;;  %1037 = vmax.xlane.f32.xlu1 %v2955_v29 }
 0x356   : > { %v2959_v30 = vpop.f32.mrf.mxu1 }
 0x358   : > { %v2961_v31 = vpop.f32.mrf.mxu1 }
 0x359   : > { %1039 = vmax.xlane.f32.xlu0 %v2953_v28  ;;  %1043 = vmax.xlane.f32.xlu1 %v2959_v30 }
 0x35a   : > { %v2965_v32 = vpop.f32.mrf.mxu1 }
 0x35c   : > { %v2967_v33 = vpop.f32.mrf.mxu1 }
 0x35d   : > { %1041 = vmax.xlane.f32.xlu1 %v2961_v31  ;;  %1045 = vmax.xlane.f32.xlu0 %v2967_v33 }
 0x361   : > { %1047 = vmax.xlane.f32.xlu0 %v2965_v32 }
 0x36e   : > { %644 = vperm.xlu1 %2404, %v614_v34  }
 0x377   : > { %654 = vperm.xlu0 %2403, %v616_v35   ;;  %v3055_v35 = vld [vmem:[#allocation3 + $0x60] sm:$0xff] }
 0x37b   : > { %649 = vperm.xlu0 %2403, %v615_v36   ;;  %v3057_v36 = vld [vmem:[#allocation3 + $0x70] sm:$0xff] }
 0x3c8   : > { %v1020_v38 = vpop.xlane.xlu1 %1019 }
 0x3c9   : > { %v1050_v40 = vmax.f32 %v1002_v37, %v1020_v38 }
 0x3ca   : > { %v1018_v41 = vpop.xlane.xlu0 %1017 }
 0x3cb   : > { %1628 = vst.msk [vmem:[#allocation3 + $0x8] sm:$0xff] %vm1321_vm7, %v1050_v40  ;;  %v1049_v42 = vmax.f32 %v1001_v39, %v1018_v41  ;;  %1120 = vperm.xlu1 %2404, %v1050_v40   ;;  %v1066_v2 = vsub.f32 %v1002_v37, %v1050_v40 }
 0x3cd   : > { %1627 = vst.msk [vmem:[#allocation3] sm:$0xff] %vm1321_vm7, %v1049_v42  ;;  %v1065_v3 = vsub.f32 %v1001_v39, %v1049_v42  ;;  %v1083_v11 = vmul.f32 1.442695, %v1066_v2 }
 0x3ce   : > { %v1024_v44 = vpop.xlane.xlu0 %1023 }
 0x3cf   : > { %v2986_v45 = vmax.f32 %v2982_v43, %v1024_v44  ;;  %1115 = vperm.xlu1 %2404, %v1049_v42   ;;  %v1081_v12 = vmul.f32 1.442695, %v1065_v3  ;;  %2405 = vpow2.f32 %v1083_v11 }
 0x3d1   : > { %1630 = vst.msk [vmem:[#allocation3 + $0x18] sm:$0xff] %vm1321_vm7, %v2986_v45  ;;  %2407 = vpow2.f32 %v1081_v12  ;;  %v1068_v37 = vsub.f32 %v2982_v43, %v2986_v45 }
 0x3d2   : > { %v1022_v48 = vpop.xlane.xlu0 %1021  ;;  %v1026_v49 = vpop.xlane.xlu1 %1025 }
 0x3d3   : > { %v1051_v50 = vmax.f32 %v1003_v46, %v1022_v48  ;;  %v1053_v51 = vmax.f32 %v2988_v47, %v1026_v49  ;;  %1130 = vperm.xlu1 %2404, %v2986_v45   ;;  %v1087_v43 = vmul.f32 1.442695, %v1068_v37  ;;  %v2194_v49 = vpop.f32.mrf.mxu0 }
 0x3d5   : > { %1629 = vst.msk [vmem:[#allocation3 + $0x10] sm:$0xff] %vm1321_vm7, %v1051_v50  ;;  %1631 = vst.msk [vmem:[#allocation3 + $0x20] sm:$0xff] %vm1321_vm7, %v1053_v51  ;;  %v1067_v13 = vsub.f32 %v1003_v46, %v1051_v50  ;;  %v1069_v16 = vsub.f32 %v2988_v47, %v1053_v51  ;;  %v3073_v47 = vld [vmem:[#allocation3 + $0x78] sm:$0xff] }
 0x3d6   : > { %v1028_v54 = vpop.xlane.xlu0 %1027  ;;  %v1030_v55 = vpop.xlane.xlu1 %1029 }
 0x3d7   : > { %v3001_v56 = vmax.f32 %v2994_v52, %v1028_v54  ;;  %v3004_v57 = vmax.f32 %v2996_v53, %v1030_v55  ;;  %1125 = vperm.xlu1 %2404, %v1051_v50   ;;  %v1085_v38 = vmul.f32 1.442695, %v1067_v13  ;;  %v1089_v41 = vmul.f32 1.442695, %v1069_v16  ;;  %v3089_v55 = vpop.f32.mrf.mxu0 }
 0x3d9   : > { %1632 = vst.msk [vmem:[#allocation3 + $0x28] sm:$0xff] %vm1321_vm7, %v3001_v56  ;;  %1633 = vst.msk [vmem:[#allocation3 + $0x30] sm:$0xff] %vm1321_vm7, %v3004_v57  ;;  %1140 = vperm.xlu0 %2403, %v3001_v56   ;;  %v1071_v42 = vsub.f32 %v2996_v53, %v3004_v57  ;;  %2409 = vpow2.f32 %v1085_v38  ;;  %v1070_v45 = vsub.f32 %v2994_v52, %v3001_v56 }
 0x3da   : > { %v1032_v60 = vpop.xlane.xlu0 %1031  ;;  %v1034_v61 = vpop.xlane.xlu1 %1033  ;;  %2411 = vpow2.f32 %v1089_v41 }
 0x3db   : > { %v3016_v62 = vmax.f32 %v3006_v58, %v1032_v60  ;;  %v3019_v63 = vmax.f32 %v3008_v59, %v1034_v61  ;;  %2413 = vpow2.f32 %v1087_v43  ;;  %v1091_v52 = vmul.f32 1.442695, %v1070_v45  ;;  %v2197_v61 = vpop.f32.mrf.mxu0 }
 0x3dd   : > { %1634 = vst.msk [vmem:[#allocation3 + $0x38] sm:$0xff] %vm1321_vm7, %v3016_v62  ;;  %1635 = vst.msk [vmem:[#allocation3 + $0x40] sm:$0xff] %vm1321_vm7, %v3019_v63  ;;  %1150 = vperm.xlu1 %2404, %v3016_v62   ;;  %1135 = vperm.xlu0 %2403, %v1053_v51   ;;  %v1093_v51 = vmul.f32 1.442695, %v1071_v42  ;;  %v1073_v53 = vsub.f32 %v3008_v59, %v3019_v63  ;;  %v1072_v56 = vsub.f32 %v3006_v58, %v3016_v62 }
 0x3de   : > { %v1036_v4 = vpop.xlane.xlu0 %1035  ;;  %v1038_v5 = vpop.xlane.xlu1 %1037 }
 0x3df   : > { %v3034_v7 = vmax.f32 %v3021_v0, %v1036_v4  ;;  %v3037_v8 = vmax.f32 %v3023_v1, %v1038_v5  ;;  %2415 = vpow2.f32 %v1093_v51  ;;  %v1097_v59 = vmul.f32 1.442695, %v1073_v53 }
 0x3e0   : > { %2417 = vpow2.f32 %v1091_v52  ;;  %v1095_v2 = vmul.f32 1.442695, %v1072_v56 }
 0x3e1   : > { %1636 = vst.msk [vmem:[#allocation3 + $0x48] sm:$0xff] %vm1321_vm7, %v3034_v7  ;;  %1637 = vst.msk [vmem:[#allocation3 + $0x50] sm:$0xff] %vm1321_vm7, %v3037_v8  ;;  %1145 = vperm.xlu1 %2404, %v3004_v57   ;;  %639 = vperm.xlu0 %2403, %v613_v6   ;;  %v1075_v60 = vsub.f32 %v3023_v1, %v3037_v8  ;;  %v1074_v3 = vsub.f32 %v3021_v0, %v3034_v7  ;;  %2419 = vpow2.f32 %v1097_v59  ;;  %v782_v6 = vpop.f32.mrf.mxu0 }
 0x3e2   : > { %v1040_v14 = vpop.xlane.xlu0 %1039  ;;  %v1044_v15 = vpop.xlane.xlu1 %1043  ;;  %2421 = vpow2.f32 %v1095_v2 }
 0x3e3   : > { %v3050_v17 = vmax.f32 %v3039_v9, %v1040_v14  ;;  %v3053_v34 = vmax.f32 %v3041_v10, %v1044_v15  ;;  %v1101_v58 = vmul.f32 1.442695, %v1075_v60 }
 0x3e5   : > { %1638 = vst.msk [vmem:[#allocation3 + $0x58] sm:$0xff] %vm1321_vm7, %v3050_v17  ;;  %1640 = vst.msk [vmem:[#allocation3 + $0x68] sm:$0xff] %vm1321_vm7, %v3053_v34  ;;  %1160 = vperm.xlu1 %2404, %v3034_v7   ;;  %1155 = vperm.xlu0 %2403, %v3019_v63   ;;  %v3102_v63 = vpop.eup %2405  ;;  %2423 = vpow2.f32 %v1101_v58  ;;  %v1076_v0 = vsub.f32 %v3039_v9, %v3050_v17  ;;  %v1078_v9 = vsub.f32 %v3041_v10, %v3053_v34 }
 0x3e6   : > { %v1042_v39 = vpop.xlane.xlu1 %1041  ;;  %v1046_v40 = vpop.xlane.xlu0 %1045 }
 0x3e7   : > { %v1061_v44 = vmax.f32 %v3055_v35, %v1042_v39  ;;  %v3071_v46 = vmax.f32 %v3057_v36, %v1046_v40  ;;  %v3106_v5 = vpop.eup %2407  ;;  %v1103_v37 = vmul.f32 1.442695, %v1076_v0  ;;  %v1107_v39 = vmul.f32 1.442695, %v1078_v9 }
 0x3e8   : > { %v3111_v12 = vpop.eup %2409 }
 0x3e9   : > { %1639 = vst.msk [vmem:[#allocation3 + $0x60] sm:$0xff] %vm1321_vm7, %v1061_v44  ;;  %v1079_v48 = vsub.f32 %v3057_v36, %v3071_v46  ;;  %1641 = vst.msk [vmem:[#allocation3 + $0x70] sm:$0xff] %vm1321_vm7, %v3071_v46  ;;  %1170 = vperm.xlu1 %2404, %v3050_v17   ;;  %1165 = vperm.xlu0 %2403, %v3037_v8   ;;  %v1077_v62 = vsub.f32 %v3055_v35, %v1061_v44  ;;  %v1099_v8 = vmul.f32 1.442695, %v1074_v3  ;;  %v3115_v15 = vpop.eup %2411 }
 0x3ea   : > { %v1048_v50 = vpop.xlane.xlu0 %1047  ;;  %v645_v13 = vpop.permute.xlu1 %644 }
 0x3eb   : > { %v3087_v54 = vmax.f32 %v3073_v47, %v1048_v50  ;;  %v1105_v7 = vmul.f32 1.442695, %v1077_v62  ;;  %2425 = vpow2.f32 %v1099_v8  ;;  %v778_v16 = vadd.f32 %v2194_v49, %v645_v13  ;;  %v3119_v35 = vpop.eup %2413 }
 0x3ec   : > { %v3123_v17 = vpop.eup %2415 }
 0x3ed   : > { %v1080_v57 = vsub.f32 %v3073_v47, %v3087_v54  ;;  %1642 = vst.msk [vmem:[#allocation3 + $0x78] sm:$0xff] %vm1321_vm7, %v3087_v54  ;;  %1175 = vperm.xlu0 %2403, %v1061_v44   ;;  %1185 = vperm.xlu1 %2404, %v3071_v46   ;;  %2427 = vpow2.f32 %v1105_v7  ;;  %v3127_v38 = vpop.eup %2417 }
 0x3ee   : > { %2429 = vpow2.f32 %v1103_v37  ;;  %v3129_v40 = vpop.eup %2419 }
 0x3ef   : > { %v3133_v10 = vpop.eup %2421  ;;  %2431 = vpow2.f32 %v1107_v39 }
 0x3f1   : > { %1180 = vperm.xlu0 %2403, %v3053_v34   ;;  %1190 = vperm.xlu1 %2404, %v3087_v54  }
 0x3f2   : > { %v655_v4 = vpop.permute.xlu0 %654  ;;  %v3135_v34 = vpop.eup %2423 }
 0x3f3   : > { %v788_v1 = vadd.f32 %v2197_v61, %v655_v4 }
 0x3f5   : > { %1506 = vperm.xlu0 %2403, %v3102_v63   ;;  %1501 = vperm.xlu1 %2404, %v3106_v5  }
 0x3f6   : > { %2230 = vmatprep.subr.mxu0 %v788_v1  ;;  %2299 = vmatprep.subr.mxu1 %v788_v1  ;;  %v650_v11 = vpop.permute.xlu0 %649 }
 0x3f7   : > { %2231 = vmatpush3.xpose.msra.mxu0 %v788_v1  ;;  %2303 = vmatpush3.xpose.msra.mxu1 %v788_v1  ;;  %v783_v14 = vadd.f32 %v782_v6, %v650_v11 }
 0x3f8   : > { %v3139_v41 = vpop.eup %2425 }
 0x3f9   : > { %1521 = vperm.xlu0 %2403, %v3115_v15   ;;  %1511 = vperm.xlu1 %2404, %v3111_v12  }
 0x3fa   : > { %2232 = vmatprep.subr.mxu0 %v783_v14  ;;  %2300 = vmatprep.subr.mxu1 %v783_v14  ;;  %v3141_v42 = vpop.eup %2427 }
 0x3fb   : > { %2233 = vmatpush3.xpose.msra.mxu0 %v783_v14  ;;  %2304 = vmatpush3.xpose.msra.mxu1 %v783_v14  ;;  %v3145_v44 = vpop.eup %2429 }
 0x3fc   : > { %2234 = vmatprep.subr.mxu0 %v778_v16  ;;  %2301 = vmatprep.subr.mxu1 %v778_v16  ;;  %v3148_v43 = vpop.eup %2431 }
 0x3fd   : > { %1531 = vperm.xlu0 %2403, %v3123_v17   ;;  %1516 = vperm.xlu1 %2404, %v3119_v35  }
 0x3ff   : > { %2235 = vmatpush3.xpose.msra.mxu0 %v778_v16  ;;  %2305 = vmatpush3.xpose.msra.mxu1 %v778_v16 }
 0x401   : > { %1541 = vperm.xlu0 %2403, %v3129_v40   ;;  %1526 = vperm.xlu1 %2404, %v3127_v38  }
 0x405   : > { %1551 = vperm.xlu0 %2403, %v3135_v34   ;;  %1536 = vperm.xlu1 %2404, %v3133_v10  }
 0x409   : > { %1561 = vperm.xlu0 %2403, %v3141_v42   ;;  %1546 = vperm.xlu1 %2404, %v3139_v41  }
 0x40d   : > { %1556 = vperm.xlu1 %2404, %v3145_v44  }
 0x411   : > { %1566 = vperm.xlu1 %2404, %v3148_v43  }
 0x446   : > { %v1121_v45 = vpop.permute.xlu1 %1120 }
 0x447   : > { %v1194_v49 = vsub.f32 %v2924_v18, %v1121_v45 }
 0x449   : > { %v1211_v50 = vmul.f32 1.442695, %v1194_v49 }
 0x44a   : > { %v1116_v51 = vpop.permute.xlu1 %1115 }
 0x44b   : > { %2433 = vpow2.f32 %v1211_v50  ;;  %v1193_v53 = vsub.f32 %v2927_v19, %v1116_v51 }
 0x44d   : > { %v1209_v52 = vmul.f32 1.442695, %v1193_v53 }
 0x44e   : > { %v1131_v56 = vpop.permute.xlu1 %1130 }
 0x44f   : > { %2435 = vpow2.f32 %v1209_v52  ;;  %v1196_v59 = vsub.f32 %v2930_v20, %v1131_v56 }
 0x451   : > { %v1215_v60 = vmul.f32 1.442695, %v1196_v59 }
 0x452   : > { %v1126_v61 = vpop.permute.xlu1 %1125 }
 0x453   : > { %2437 = vpow2.f32 %v1215_v60  ;;  %v1195_v2 = vsub.f32 %v2932_v21, %v1126_v61 }
 0x454   : > { %v1141_v3 = vpop.permute.xlu0 %1140 }
 0x455   : > { %v1213_v4 = vmul.f32 1.442695, %v1195_v2  ;;  %v1198_v58 = vsub.f32 %v2935_v22, %v1141_v3 }
 0x457   : > { %2439 = vpow2.f32 %v1213_v4  ;;  %v1219_v18 = vmul.f32 1.442695, %v1198_v58 }
 0x458   : > { %v2434_v62 = vpop.eup %2433  ;;  %v1151_v1 = vpop.permute.xlu1 %1150 }
 0x459   : > { %v1136_v6 = vpop.permute.xlu0 %1135  ;;  %v1200_v19 = vsub.f32 %v2941_v24, %v1151_v1  ;;  %1275 = vadd.xlane.f32.xlu1 %v2434_v62  ;;  %2441 = vpow2.f32 %v1219_v18 }
 0x45a   : > { %v1197_v8 = vsub.f32 %v2937_v23, %v1136_v6 }
 0x45b   : > { %v1223_v20 = vmul.f32 1.442695, %v1200_v19 }
 0x45c   : > { %v1217_v11 = vmul.f32 1.442695, %v1197_v8  ;;  %v2436_v0 = vpop.eup %2435  ;;  %v1146_v7 = vpop.permute.xlu1 %1145 }
 0x45d   : > { %v640_v21 = vpop.permute.xlu0 %639  ;;  %v1199_v13 = vsub.f32 %v2943_v25, %v1146_v7  ;;  %2238 = vmatprep.mubr.f32.mxu0 %v2436_v0  ;;  %1273 = vadd.xlane.f32.xlu0 %v2436_v0  ;;  %v1111_v0 = vmul.f32 1.442695, %v1080_v57  ;;  %v1109_v7 = vmul.f32 1.442695, %v1079_v48 }
 0x45e   : > { %v773_v22 = vadd.f32 %v3089_v55, %v640_v21  ;;  %2443 = vpow2.f32 %v1217_v11 }
 0x45f   : > { %2445 = vpow2.f32 %v1223_v20  ;;  %v1221_v14 = vmul.f32 1.442695, %v1199_v13 }
 0x460   : > { %2236 = vmatprep.subr.mxu0 %v773_v22  ;;  %2302 = vmatprep.subr.mxu1 %v773_v22  ;;  %v2438_v24 = vpop.eup %2437  ;;  %v1161_v23 = vpop.permute.xlu1 %1160 }
 0x461   : > { %2237 = vmatpush3.xpose.msra.mxu0 %v773_v22  ;;  %2306 = vmatpush3.xpose.msra.mxu1 %v773_v22  ;;  %v1156_v16 = vpop.permute.xlu0 %1155  ;;  %2447 = vpow2.f32 %v1221_v14  ;;  %v1202_v37 = vsub.f32 %v2947_v26, %v1161_v23 }
 0x462   : > { %v1201_v9 = vsub.f32 %v2949_v27, %v1156_v16  ;;  %1279 = vadd.xlane.f32.xlu0 %v2438_v24 }
 0x463   : > { %v1227_v25 = vmul.f32 1.442695, %v1202_v37 }
 0x464   : > { %v1225_v55 = vmul.f32 1.442695, %v1201_v9  ;;  %2239 = vmatmul.mubr.f32.vlgmr.msra.gmra.mxu0 %v2434_v62  ;;  %v2440_v39 = vpop.eup %2439  ;;  %v1171_v45 = vpop.permute.xlu1 %1170 }
 0x465   : > { %v1166_v49 = vpop.permute.xlu0 %1165  ;;  %2449 = vpow2.f32 %v1227_v25  ;;  %v1204_v50 = vsub.f32 %v2953_v28, %v1171_v45  ;;  %2241 = vmatprep.mubr.f32.mxu0 %v2440_v39  ;;  %v1242_v25 = vld [vmem:[#allocation4 + $0x8] sm:$0xff] }
 0x466   : > { %v1203_v51 = vsub.f32 %v2955_v29, %v1166_v49  ;;  %1277 = vadd.xlane.f32.xlu0 %v2440_v39  ;;  %2451 = vpow2.f32 %v1225_v55  ;;  %v2442_v26 = vpop.eup %2441  ;;  %v1258_v55 = vmul.f32 %v3102_v63, %v1242_v25  ;;  %v1241_v49 = vld [vmem:[#allocation4] sm:$0xff] }
 0x467   : > { %v1231_v53 = vmul.f32 1.442695, %v1204_v50 }
 0x468   : > { %v1229_v52 = vmul.f32 1.442695, %v1203_v51  ;;  %2242 = vmatmul.mubr.f32.gmra.mxu0 %v2438_v24  ;;  %v1186_v27 = vpop.permute.xlu1 %1185  ;;  %v1257_v51 = vmul.f32 %v3106_v5, %v1241_v49 }
 0x469   : > { %v1176_v56 = vpop.permute.xlu0 %1175  ;;  %2453 = vpow2.f32 %v1231_v53  ;;  %v1207_v59 = vsub.f32 %v2967_v33, %v1186_v27 }
 0x46a   : > { %v1205_v60 = vsub.f32 %v2961_v31, %v1176_v56  ;;  %1283 = vadd.xlane.f32.xlu0 %v2442_v26  ;;  %2455 = vpow2.f32 %v1229_v52  ;;  %v1244_v52 = vld [vmem:[#allocation4 + $0x18] sm:$0xff] }
 0x46b   : > { %v2444_v61 = vpop.eup %2443  ;;  %v1237_v28 = vmul.f32 1.442695, %v1207_v59  ;;  %v1260_v27 = vmul.f32 %v3119_v35, %v1244_v52  ;;  %v1243_v59 = vld [vmem:[#allocation4 + $0x10] sm:$0xff] }
 0x46c   : > { %v1233_v2 = vmul.f32 1.442695, %v1205_v60  ;;  %v2446_v29 = vpop.eup %2445  ;;  %1281 = vadd.xlane.f32.xlu1 %v2444_v61  ;;  %2244 = vmatprep.mubr.f32.mxu0 %v2444_v61  ;;  %v1191_v3 = vpop.permute.xlu1 %1190  ;;  %v1259_v63 = vmul.f32 %v3111_v12, %v1243_v59  ;;  %v1255_v52 = vld [vmem:[#allocation4 + $0x70] sm:$0xff] }
 0x46d   : > { %v1181_v4 = vpop.permute.xlu0 %1180  ;;  %2457 = vpow2.f32 %v1237_v28  ;;  %v1208_v58 = vsub.f32 %v2965_v32, %v1191_v3  ;;  %2245 = vmatmul.mubr.f32.gmra.mxu0 %v2442_v26  ;;  %v1246_v28 = vld [vmem:[#allocation4 + $0x28] sm:$0xff] }
 0x46e   : > { %v1206_v18 = vsub.f32 %v2959_v30, %v1181_v4  ;;  %1287 = vadd.xlane.f32.xlu0 %v2446_v29  ;;  %v2448_v33 = vpop.eup %2447  ;;  %2459 = vpow2.f32 %v1233_v2  ;;  %v1262_v5 = vmul.f32 %v3127_v38, %v1246_v28  ;;  %v1248_v4 = vld [vmem:[#allocation4 + $0x38] sm:$0xff]  ;;  %v1250_v38 = vld [vmem:[#allocation4 + $0x48] sm:$0xff] }
 0x46f   : > { %v1239_v31 = vmul.f32 1.442695, %v1208_v58  ;;  %2247 = vmatprep.mubr.f32.mxu0 %v2448_v33 }
 0x470   : > { %v1235_v62 = vmul.f32 1.442695, %v1206_v18  ;;  %1285 = vadd.xlane.f32.xlu1 %v2448_v33  ;;  %v3180_v47 = vpop.permute.xlu1 %1501  ;;  %v1264_v33 = vmul.f32 %v3133_v10, %v1248_v4 }
 0x471   : > { %2461 = vpow2.f32 %v1239_v31  ;;  %2248 = vmatmul.mubr.f32.gmra.mxu0 %v2446_v29  ;;  %v3186_v22 = vpop.permute.xlu0 %1506  ;;  %v1245_v29 = vld [vmem:[#allocation4 + $0x20] sm:$0xff]  ;;  %v1247_v31 = vld [vmem:[#allocation4 + $0x30] sm:$0xff] }
 0x472   : > { %v2450_v1 = vpop.eup %2449  ;;  %2463 = vpow2.f32 %v1235_v62  ;;  %v1261_v35 = vmul.f32 %v3115_v15, %v1245_v29  ;;  %v1266_v15 = vmul.f32 %v3139_v41, %v1250_v38  ;;  %v1483_v29 = vld [vmem:[#allocation5] sm:$0xff] }
 0x473   : > { %v2452_v6 = vpop.eup %2451  ;;  %1291 = vadd.xlane.f32.xlu0 %v2450_v1  ;;  %2465 = vpow2.f32 %v1111_v0  ;;  %v1579_v4 = vmul.f32 %v3180_v47, %v1483_v29  ;;  %v1487_v47 = vld [vmem:[#allocation5 + $0x20] sm:$0xff] }
 0x474   : > { %1289 = vadd.xlane.f32.xlu1 %v2452_v6  ;;  %2250 = vmatprep.mubr.f32.mxu0 %v2452_v6  ;;  %2467 = vpow2.f32 %v1109_v7  ;;  %v3182_v54 = vpop.permute.xlu1 %1511  ;;  %v1263_v6 = vmul.f32 %v3123_v17, %v1247_v31  ;;  %v1251_v7 = vld [vmem:[#allocation4 + $0x50] sm:$0xff] }
 0x475   : > { %2251 = vmatmul.mubr.f32.gmra.mxu0 %v2450_v1  ;;  %v3190_v36 = vpop.permute.xlu0 %1521 }
 0x476   : > { %v2454_v32 = vpop.eup %2453 }
 0x477   : > { %v2456_v19 = vpop.eup %2455  ;;  %1295 = vadd.xlane.f32.xlu0 %v2454_v32 }
 0x478   : > { %1293 = vadd.xlane.f32.xlu1 %v2456_v19  ;;  %2253 = vmatprep.mubr.f32.mxu0 %v2456_v19  ;;  %v3184_v57 = vpop.permute.xlu1 %1516  ;;  %v1249_v19 = vld [vmem:[#allocation4 + $0x40] sm:$0xff] }
 0x479   : > { %2254 = vmatmul.mubr.f32.gmra.mxu0 %v2454_v32  ;;  %v3194_v48 = vpop.permute.xlu0 %1531  ;;  %v1265_v10 = vmul.f32 %v3129_v40, %v1249_v19  ;;  %v1583_v19 = vmul.f32 %v3190_v36, %v1487_v47 }
 0x47a   : > { %v2458_v30 = vpop.eup %2457 }
 0x47b   : > { %v2460_v8 = vpop.eup %2459  ;;  %2259 = vmatprep.mubr.f32.mxu1 %v2458_v30 }
 0x47c   : > { %1297 = vadd.xlane.f32.xlu1 %v2460_v8  ;;  %2256 = vmatprep.mubr.f32.mxu0 %v2460_v8  ;;  %v3188_v14 = vpop.permute.xlu1 %1526 }
 0x47d   : > { %v3198_v23 = vpop.permute.xlu0 %1541 }
 0x47e   : > { %v2462_v20 = vpop.eup %2461 }
 0x47f   : > { %v2464_v11 = vpop.eup %2463  ;;  %2260 = vmatmul.mubr.f32.vlgmr.msra.gmra.mxu1 %v2462_v20 }
 0x480   : > { %1301 = vadd.xlane.f32.xlu1 %v2458_v30  ;;  %1299 = vadd.xlane.f32.xlu0 %v2464_v11  ;;  %v3174_v21 = vpop.eup %2465  ;;  %v3192_v46 = vpop.permute.xlu1 %1536 }
 0x481   : > { %2257 = vmatmul.mubr.f32.gmra.mxu0 %v2464_v11  ;;  %v3177_v13 = vpop.eup %2467  ;;  %v3202_v37 = vpop.permute.xlu0 %1551 }
 0x484   : > { %1303 = vadd.xlane.f32.xlu0 %v2462_v20  ;;  %v3196_v24 = vpop.permute.xlu1 %1546  ;;  %v1252_v20 = vld [vmem:[#allocation4 + $0x58] sm:$0xff] }
 0x485   : > { %v3207_v39 = vpop.permute.xlu0 %1561  ;;  %v1268_v17 = vmul.f32 %v3145_v44, %v1252_v20  ;;  %v1271_v44 = vmul.f32 %v3177_v13, %v1255_v52  ;;  %v1492_v20 = vld [vmem:[#allocation5 + $0x48] sm:$0xff]  ;;  %v1498_v52 = vld [vmem:[#allocation5 + $0x78] sm:$0xff] }
 0x488   : > { %v3200_v16 = vpop.permute.xlu1 %1556 }
 0x48c   : > { %v3204_v9 = vpop.permute.xlu1 %1566 }
 0x491   : > { %1576 = vperm.xlu1 %2404, %v3174_v21  }
 0x49a   : > { %1571 = vperm.xlu0 %2403, %v3177_v13  }
 0x4e2   : > { %v1276_v45 = vpop.xlane.xlu1 %1275 }
 0x4e3   : > { %v1306_v50 = vadd.f32 %v1276_v45, %v1258_v55  ;;  %v1267_v55 = vmul.f32 %v3135_v34, %v1251_v7  ;;  %v1491_v7 = vld [vmem:[#allocation5 + $0x40] sm:$0xff] }
 0x4e5   : > { %1323 = vst.msk [vmem:[#allocation4 + $0x8] sm:$0xff] %vm1321_vm7, %v1306_v50  ;;  %v1253_v50 = vld [vmem:[#allocation4 + $0x60] sm:$0xff] }
 0x4e6   : > { %v1274_v53 = vpop.xlane.xlu0 %1273  ;;  %v1269_v40 = vmul.f32 %v3141_v42, %v1253_v50 }
 0x4e7   : > { %v1305_v26 = vadd.f32 %v1274_v53, %v1257_v51 }
 0x4e9   : > { %1322 = vst.msk [vmem:[#allocation4] sm:$0xff] %vm1321_vm7, %v1305_v26  ;;  %v1254_v26 = vld [vmem:[#allocation4 + $0x68] sm:$0xff] }
 0x4ea   : > { %v1270_v34 = vmul.f32 %v3148_v43, %v1254_v26  ;;  %v1486_v43 = vld [vmem:[#allocation5 + $0x18] sm:$0xff] }
 0x4eb   : > { %v1280_v56 = vpop.xlane.xlu0 %1279 }
 0x4ec   : > { %v1308_v60 = vadd.f32 %v1280_v56, %v1260_v27 }
 0x4ee   : > { %1325 = vst.msk [vmem:[#allocation4 + $0x18] sm:$0xff] %vm1321_vm7, %v1308_v60  ;;  %v1256_v60 = vld [vmem:[#allocation4 + $0x78] sm:$0xff] }
 0x4ef   : > { %v1278_v61 = vpop.xlane.xlu0 %1277  ;;  %v1272_v42 = vmul.f32 %v3174_v21, %v1256_v60 }
 0x4f0   : > { %v1307_v2 = vadd.f32 %v1278_v61, %v1259_v63 }
 0x4f2   : > { %1324 = vst.msk [vmem:[#allocation4 + $0x10] sm:$0xff] %vm1321_vm7, %v1307_v2 }
 0x4f3   : > { %v1284_v3 = vpop.xlane.xlu0 %1283 }
 0x4f4   : > { %v1310_v58 = vadd.f32 %v1284_v3, %v1262_v5  ;;  %v1484_v5 = vld [vmem:[#allocation5 + $0x8] sm:$0xff] }
 0x4f5   : > { %v1282_v18 = vpop.xlane.xlu1 %1281  ;;  %v1580_v13 = vmul.f32 %v3186_v22, %v1484_v5 }
 0x4f6   : > { %1327 = vst.msk [vmem:[#allocation4 + $0x28] sm:$0xff] %vm1321_vm7, %v1310_v58  ;;  %v1309_v12 = vadd.f32 %v1282_v18, %v1261_v35  ;;  %v1485_v35 = vld [vmem:[#allocation5 + $0x10] sm:$0xff] }
 0x4f7   : > { %v1288_v62 = vpop.xlane.xlu0 %1287 }
 0x4f8   : > { %v1312_v1 = vadd.f32 %v1288_v62, %v1264_v33  ;;  %1326 = vst.msk [vmem:[#allocation4 + $0x20] sm:$0xff] %vm1321_vm7, %v1309_v12  ;;  %v1582_v33 = vmul.f32 %v3184_v57, %v1486_v43  ;;  %v1581_v12 = vmul.f32 %v3182_v54, %v1485_v35  ;;  %v1490_v57 = vld [vmem:[#allocation5 + $0x38] sm:$0xff] }
 0x4f9   : > { %v1286_v32 = vpop.xlane.xlu1 %1285 }
 0x4fa   : > { %1329 = vst.msk [vmem:[#allocation4 + $0x38] sm:$0xff] %vm1321_vm7, %v1312_v1  ;;  %v1311_v30 = vadd.f32 %v1286_v32, %v1263_v6  ;;  %v1488_v1 = vld [vmem:[#allocation5 + $0x28] sm:$0xff] }
 0x4fb   : > { %v1584_v38 = vmul.f32 %v3188_v14, %v1488_v1 }
 0x4fc   : > { %1328 = vst.msk [vmem:[#allocation4 + $0x30] sm:$0xff] %vm1321_vm7, %v1311_v30  ;;  %v1292_v8 = vpop.xlane.xlu0 %1291 }
 0x4fd   : > { %v1290_v11 = vpop.xlane.xlu1 %1289  ;;  %v1314_v0 = vadd.f32 %v1292_v8, %v1266_v15  ;;  %v1489_v15 = vld [vmem:[#allocation5 + $0x30] sm:$0xff] }
 0x4fe   : > { %v1313_v25 = vadd.f32 %v1290_v11, %v1265_v10  ;;  %v1586_v10 = vmul.f32 %v3192_v46, %v1490_v57  ;;  %v1587_v46 = vmul.f32 %v3198_v23, %v1491_v7 }
 0x4ff   : > { %1331 = vst.msk [vmem:[#allocation4 + $0x48] sm:$0xff] %vm1321_vm7, %v1314_v0  ;;  %v1585_v0 = vmul.f32 %v3194_v48, %v1489_v15 }
 0x500   : > { %1330 = vst.msk [vmem:[#allocation4 + $0x40] sm:$0xff] %vm1321_vm7, %v1313_v25  ;;  %v1296_v45 = vpop.xlane.xlu0 %1295 }
 0x501   : > { %v1294_v41 = vpop.xlane.xlu1 %1293  ;;  %v1316_v49 = vadd.f32 %v1296_v45, %v1268_v17  ;;  %v1588_v17 = vmul.f32 %v3196_v24, %v1492_v20 }
 0x502   : > { %v1315_v51 = vadd.f32 %v1294_v41, %v1267_v55  ;;  %v1494_v55 = vld [vmem:[#allocation5 + $0x58] sm:$0xff] }
 0x503   : > { %1333 = vst.msk [vmem:[#allocation4 + $0x58] sm:$0xff] %vm1321_vm7, %v1316_v49  ;;  %v1493_v49 = vld [vmem:[#allocation5 + $0x50] sm:$0xff]  ;;  %v1590_v48 = vmul.f32 %v3200_v16, %v1494_v55  ;;  %v1495_v16 = vld [vmem:[#allocation5 + $0x60] sm:$0xff] }
 0x504   : > { %1332 = vst.msk [vmem:[#allocation4 + $0x50] sm:$0xff] %vm1321_vm7, %v1315_v51  ;;  %v1589_v24 = vmul.f32 %v3202_v37, %v1493_v49 }
 0x505   : > { %v1298_v53 = vpop.xlane.xlu1 %1297 }
 0x506   : > { %v1317_v27 = vadd.f32 %v1298_v53, %v1269_v40 }
 0x508   : > { %1334 = vst.msk [vmem:[#allocation4 + $0x60] sm:$0xff] %vm1321_vm7, %v1317_v27 }
 0x509   : > { %v1302_v56 = vpop.xlane.xlu1 %1301  ;;  %v1300_v59 = vpop.xlane.xlu0 %1299 }
 0x50a   : > { %v1319_v63 = vadd.f32 %v1302_v56, %v1271_v44  ;;  %v1318_v61 = vadd.f32 %v1300_v59, %v1270_v34  ;;  %v1496_v44 = vld [vmem:[#allocation5 + $0x68] sm:$0xff]  ;;  %v1497_v34 = vld [vmem:[#allocation5 + $0x70] sm:$0xff] }
 0x50c   : > { %1336 = vst.msk [vmem:[#allocation4 + $0x70] sm:$0xff] %vm1321_vm7, %v1319_v63  ;;  %1335 = vst.msk [vmem:[#allocation4 + $0x68] sm:$0xff] %vm1321_vm7, %v1318_v61  ;;  %v1592_v63 = vmul.f32 %v3204_v9, %v1496_v44 }
 0x50d   : > { %v1304_v28 = vpop.xlane.xlu0 %1303  ;;  %v1577_v26 = vpop.permute.xlu1 %1576 }
 0x50e   : > { %v1320_v2 = vadd.f32 %v1304_v28, %v1272_v42  ;;  %v1594_v59 = vmul.f32 %v1577_v26, %v1498_v52 }
 0x510   : > { %1337 = vst.msk [vmem:[#allocation4 + $0x78] sm:$0xff] %vm1321_vm7, %v1320_v2  ;;  %v1591_v2 = vmul.f32 %v3207_v39, %v1495_v16 }
 0x515   : > { %v1572_v56 = vpop.permute.xlu0 %1571 }
 0x516   : > { %v1593_v37 = vmul.f32 %v1572_v56, %v1497_v34 }
 0x524   : > { %v2240_v3 = vpop.f32.mrf.mxu0 }
 0x525   : > { %v1596_v58 = vadd.f32 %v2240_v3, %v1580_v13 }
 0x526   : > { %v1404_v18 = vpop.f32.mrf.mxu0 }
 0x527   : > { %1612 = vst.msk [vmem:[#allocation5 + $0x8] sm:$0xff] %vm807_vm6, %v1596_v58  ;;  %v1595_v21 = vadd.f32 %v1579_v4, %v1404_v18 }
 0x528   : > { %v2243_v31 = vpop.f32.mrf.mxu0 }
 0x529   : > { %1611 = vst.msk [vmem:[#allocation5] sm:$0xff] %vm807_vm6, %v1595_v21  ;;  %v1598_v62 = vadd.f32 %v2243_v31, %v1582_v33 }
 0x52a   : > { %v1414_v22 = vpop.f32.mrf.mxu0 }
 0x52b   : > { %1614 = vst.msk [vmem:[#allocation5 + $0x18] sm:$0xff] %vm807_vm6, %v1598_v62  ;;  %v1597_v6 = vadd.f32 %v1581_v12, %v1414_v22 }
 0x52d   : > { %1613 = vst.msk [vmem:[#allocation5 + $0x10] sm:$0xff] %vm807_vm6, %v1597_v6  ;;  %v2246_v32 = vpop.f32.mrf.mxu0 }
 0x52e   : > { %v1600_v30 = vadd.f32 %v2246_v32, %v1584_v38 }
 0x52f   : > { %v1424_v54 = vpop.f32.mrf.mxu0 }
 0x530   : > { %1616 = vst.msk [vmem:[#allocation5 + $0x28] sm:$0xff] %vm807_vm6, %v1600_v30  ;;  %v1599_v8 = vadd.f32 %v1583_v19, %v1424_v54 }
 0x531   : > { %v2249_v11 = vpop.f32.mrf.mxu0 }
 0x532   : > { %1615 = vst.msk [vmem:[#allocation5 + $0x20] sm:$0xff] %vm807_vm6, %v1599_v8  ;;  %v1602_v14 = vadd.f32 %v2249_v11, %v1586_v10 }
 0x533   : > { %v1434_v25 = vpop.f32.mrf.mxu0 }
 0x534   : > { %1618 = vst.msk [vmem:[#allocation5 + $0x38] sm:$0xff] %vm807_vm6, %v1602_v14  ;;  %v1601_v36 = vadd.f32 %v1585_v0, %v1434_v25 }
 0x535   : > { %v2252_v45 = vpop.f32.mrf.mxu0 }
 0x536   : > { %1617 = vst.msk [vmem:[#allocation5 + $0x30] sm:$0xff] %vm807_vm6, %v1601_v36  ;;  %v1604_v41 = vadd.f32 %v2252_v45, %v1588_v17 }
 0x537   : > { %v1444_v50 = vpop.f32.mrf.mxu0 }
 0x538   : > { %1620 = vst.msk [vmem:[#allocation5 + $0x48] sm:$0xff] %vm807_vm6, %v1604_v41  ;;  %v1603_v51 = vadd.f32 %v1587_v46, %v1444_v50 }
 0x539   : > { %v2255_v40 = vpop.f32.mrf.mxu0 }
 0x53a   : > { %1619 = vst.msk [vmem:[#allocation5 + $0x40] sm:$0xff] %vm807_vm6, %v1603_v51  ;;  %v1606_v53 = vadd.f32 %v2255_v40, %v1590_v48 }
 0x53b   : > { %v1454_v27 = vpop.f32.mrf.mxu0 }
 0x53c   : > { %1622 = vst.msk [vmem:[#allocation5 + $0x58] sm:$0xff] %vm807_vm6, %v1606_v53  ;;  %v1605_v23 = vadd.f32 %v1589_v24, %v1454_v27 }
 0x53e   : > { %1621 = vst.msk [vmem:[#allocation5 + $0x50] sm:$0xff] %vm807_vm6, %v1605_v23 }
 0x53f   : > { %v2261_v60 = vpop.f32.mrf.mxu1 }
 0x540   : > { %v1610_v61 = vadd.f32 %v2261_v60, %v1594_v59 }
 0x541   : > { %v2258_v42 = vpop.f32.mrf.mxu0  ;;  %v1474_v28 = vpop.f32.mrf.mxu1 }
 0x542   : > { %v1608_v5 = vadd.f32 %v2258_v42, %v1592_v63  ;;  %1626 = vst.msk [vmem:[#allocation5 + $0x78] sm:$0xff] %vm807_vm6, %v1610_v61  ;;  %v1609_v29 = vadd.f32 %v1593_v37, %v1474_v28  ;;  %1646 = sbr.rel (%p2082_p3) target bundleno = 1753 (0x6d9), region = 60 }
 0x543   : > { %v1464_v13 = vpop.f32.mrf.mxu0 }
 0x544   : > { %1624 = vst.msk [vmem:[#allocation5 + $0x68] sm:$0xff] %vm807_vm6, %v1608_v5  ;;  %v1607_v43 = vadd.f32 %v1591_v2, %v1464_v13  ;;  %1625 = vst.msk [vmem:[#allocation5 + $0x70] sm:$0xff] %vm807_vm6, %v1609_v29 }
 0x546   : > { %1623 = vst.msk [vmem:[#allocation5 + $0x60] sm:$0xff] %vm807_vm6, %v1607_v43 }
 0x547   : > { %v1678_v9 = vld [vmem:[#allocation4 + $0x78] sm:$0xff]  ;;  %v1676_v3 = vld [vmem:[#allocation4 + $0x68] sm:$0xff]  ;;  %v1677_v4 = vld [vmem:[#allocation4 + $0x70] sm:$0xff]  ;;  %v2617_v58 = vmov 0   ;;  %v2618_v62 = vmov 0.0   ;;  %vm2619_vm8 = vmmov 0  }
 0x548   : > { %2470 = vset.pattern.permute.xlu1 %v2617_v58  ;;  %2469 = vset.pattern.permute.xlu0 %v2617_v58  ;;  %2471 = vrcp.f32 %v1678_v9  ;;  %v1675_v39 = vld [vmem:[#allocation4 + $0x60] sm:$0xff]  ;;  %v1674_v35 = vld [vmem:[#allocation4 + $0x58] sm:$0xff]  ;;  %v1673_v18 = vld [vmem:[#allocation4 + $0x50] sm:$0xff] }
 0x549   : > { %2473 = vrcp.f32 %v1676_v3  ;;  %v1672_v33 = vld [vmem:[#allocation4 + $0x48] sm:$0xff]  ;;  %v1671_v21 = vld [vmem:[#allocation4 + $0x40] sm:$0xff]  ;;  %v1670_v31 = vld [vmem:[#allocation4 + $0x38] sm:$0xff]  ;;  %2262 = vmatprep.subr.mxu0 %v2618_v62  ;;  %2294 = vmatprep.mubr.msk.f32.mxu0 %vm2619_vm8, %v2618_v62 }
 0x54a   : > { %2475 = vrcp.f32 %v1677_v4  ;;  %v1669_v12 = vld [vmem:[#allocation4 + $0x30] sm:$0xff]  ;;  %v1668_v47 = vld [vmem:[#allocation4 + $0x28] sm:$0xff]  ;;  %v1667_v57 = vld [vmem:[#allocation4 + $0x20] sm:$0xff] }
 0x54b   : > { %2477 = vrcp.f32 %v1675_v39  ;;  %v1666_v19 = vld [vmem:[#allocation4 + $0x18] sm:$0xff]  ;;  %v1665_v15 = vld [vmem:[#allocation4 + $0x10] sm:$0xff]  ;;  %v1664_v10 = vld [vmem:[#allocation4 + $0x8] sm:$0xff] }
 0x54c   : > { %2479 = vrcp.f32 %v1674_v35  ;;  %v1663_v20 = vld [vmem:[#allocation4] sm:$0xff]  ;;  %v1662_v46 = vld [vmem:[#allocation5 + $0x78] sm:$0xff]  ;;  %v1661_v50 = vld [vmem:[#allocation5 + $0x70] sm:$0xff] }
 0x54d   : > { %2481 = vrcp.f32 %v1673_v18  ;;  %v1915_v45 = vld [vmem:[%s3376_s7] sm:$0xf]  ;;  %v1660_v48 = vld [vmem:[#allocation5 + $0x68] sm:$0xff]  ;;  %v1658_v44 = vld [vmem:[#allocation5 + $0x58] sm:$0xff] }
 0x54e   : > { %2483 = vrcp.f32 %v1672_v33  ;;  %v1659_v52 = vld [vmem:[#allocation5 + $0x60] sm:$0xff]  ;;  %v1657_v59 = vld [vmem:[#allocation5 + $0x50] sm:$0xff]  ;;  %v1656_v63 = vld [vmem:[#allocation5 + $0x48] sm:$0xff] }
 0x54f   : > { %2485 = vrcp.f32 %v1671_v21  ;;  %v1655_v42 = vld [vmem:[#allocation5 + $0x40] sm:$0xff]  ;;  %v1654_v5 = vld [vmem:[#allocation5 + $0x38] sm:$0xff]  ;;  %v1653_v43 = vld [vmem:[#allocation5 + $0x30] sm:$0xff] }
 0x550   : > { %2487 = vrcp.f32 %v1670_v31  ;;  %v1652_v4 = vld [vmem:[#allocation5 + $0x28] sm:$0xff]  ;;  %v1651_v35 = vld [vmem:[#allocation5 + $0x20] sm:$0xff]  ;;  %v1650_v21 = vld [vmem:[#allocation5 + $0x18] sm:$0xff] }
 0x551   : > { %2489 = vrcp.f32 %v1669_v12 }
 0x552   : > { %2491 = vrcp.f32 %v1668_v47  ;;  %v1648_v47 = vld [vmem:[#allocation5 + $0x8] sm:$0xff] }
 0x553   : > { %2493 = vrcp.f32 %v1667_v57 }
 0x554   : > { %2495 = vrcp.f32 %v1666_v19 }
 0x555   : > { %v2472_v1 = vpop.eup %2471  ;;  %2497 = vrcp.f32 %v1665_v15  ;;  %v1913_v15 = vld [vmem:[%s2764_s13] sm:$0xf] }
 0x556   : > { %v2474_v22 = vpop.eup %2473  ;;  %1772 = vperm.xlu0 %2469, %v2472_v1   ;;  %2499 = vrcp.f32 %v1664_v10  ;;  %v1649_v1 = vld [vmem:[#allocation5 + $0x10] sm:$0xff] }
 0x557   : > { %v2476_v6 = vpop.eup %2475  ;;  %1762 = vperm.xlu1 %2470, %v2474_v22   ;;  %2501 = vrcp.f32 %v1663_v20 }
 0x558   : > { %v2478_v38 = vpop.eup %2477 }
 0x559   : > { %v2480_v32 = vpop.eup %2479 }
 0x55a   : > { %1767 = vperm.xlu0 %2469, %v2476_v6   ;;  %v2482_v30 = vpop.eup %2481 }
 0x55b   : > { %1757 = vperm.xlu1 %2470, %v2478_v38   ;;  %v2484_v54 = vpop.eup %2483 }
 0x55c   : > { %v2486_v8 = vpop.eup %2485 }
 0x55d   : > { %v2488_v11 = vpop.eup %2487 }
 0x55e   : > { %1752 = vperm.xlu0 %2469, %v2480_v32   ;;  %v2490_v0 = vpop.eup %2489  ;;  %v1647_v32 = vld [vmem:[#allocation5] sm:$0xff] }
 0x55f   : > { %1747 = vperm.xlu1 %2470, %v2482_v30   ;;  %v2492_v14 = vpop.eup %2491  ;;  %v1791_v30 = vld [vmem:[%s3375_s6] sm:$0xf] }
 0x560   : > { %v2494_v7 = vpop.eup %2493 }
 0x561   : > { %v2496_v25 = vpop.eup %2495 }
 0x562   : > { %1742 = vperm.xlu0 %2469, %v2484_v54   ;;  %v2498_v17 = vpop.eup %2497 }
 0x563   : > { %1737 = vperm.xlu1 %2470, %v2486_v8   ;;  %v2500_v36 = vpop.eup %2499 }
 0x564   : > { %v2502_v55 = vpop.eup %2501 }
 0x566   : > { %1732 = vperm.xlu0 %2469, %v2488_v11  }
 0x567   : > { %1727 = vperm.xlu1 %2470, %v2490_v0  }
 0x56a   : > { %1722 = vperm.xlu0 %2469, %v2492_v14  }
 0x56b   : > { %1717 = vperm.xlu1 %2470, %v2494_v7  }
 0x56e   : > { %1712 = vperm.xlu0 %2469, %v2496_v25  }
 0x56f   : > { %1707 = vperm.xlu1 %2470, %v2498_v17  }
 0x572   : > { %1702 = vperm.xlu0 %2469, %v2500_v36  }
 0x573   : > { %1697 = vperm.xlu1 %2470, %v2502_v55  }
 0x576   : > { %1918 = vperm.xlu0 %2469, %v1915_v45  }
 0x5d1   : > { %v1773_v41 = vpop.permute.xlu0 %1772 }
 0x5d2   : > { %v1790_v49 = vmul.f32 %v1773_v41, %v1662_v46  ;;  %v1763_v24 = vpop.permute.xlu1 %1762 }
 0x5d3   : > { %v1788_v53 = vmul.f32 %v1763_v24, %v1660_v48 }
 0x5d4   : > { %2263 = vmatpush3.xpose.msk.msra.mxu0 %vm807_vm6, %v1790_v49 }
 0x5d5   : > { %v1768_v51 = vpop.permute.xlu0 %1767  ;;  %2264 = vmatprep.subr.mxu0 %v2618_v62 }
 0x5d6   : > { %v1789_v40 = vmul.f32 %v1768_v51, %v1661_v50  ;;  %v1758_v26 = vpop.permute.xlu1 %1757 }
 0x5d7   : > { %v1787_v27 = vmul.f32 %v1758_v26, %v1659_v52 }
 0x5d8   : > { %2265 = vmatpush3.xpose.msk.msra.mxu0 %vm807_vm6, %v1789_v40 }
 0x5d9   : > { %2266 = vmatprep.subr.mxu0 %v2618_v62  ;;  %v1753_v23 = vpop.permute.xlu0 %1752 }
 0x5da   : > { %v1786_v34 = vmul.f32 %v1753_v23, %v1658_v44  ;;  %v1748_v56 = vpop.permute.xlu1 %1747 }
 0x5db   : > { %v1785_v16 = vmul.f32 %v1748_v56, %v1657_v59 }
 0x5dc   : > { %2267 = vmatpush3.xpose.msk.msra.mxu0 %vm807_vm6, %v1788_v53 }
 0x5dd   : > { %2268 = vmatprep.subr.mxu0 %v2618_v62  ;;  %v1743_v60 = vpop.permute.xlu0 %1742 }
 0x5de   : > { %v1784_v37 = vmul.f32 %v1743_v60, %v1656_v63  ;;  %v1738_v61 = vpop.permute.xlu1 %1737 }
 0x5df   : > { %v1783_v28 = vmul.f32 %v1738_v61, %v1655_v42 }
 0x5e0   : > { %2269 = vmatpush3.xpose.msk.msra.mxu0 %vm807_vm6, %v1787_v27 }
 0x5e1   : > { %2270 = vmatprep.subr.mxu0 %v2618_v62  ;;  %v1733_v2 = vpop.permute.xlu0 %1732 }
 0x5e2   : > { %v1782_v29 = vmul.f32 %v1733_v2, %v1654_v5  ;;  %v1728_v13 = vpop.permute.xlu1 %1727 }
 0x5e3   : > { %v1781_v9 = vmul.f32 %v1728_v13, %v1653_v43 }
 0x5e4   : > { %2271 = vmatpush3.xpose.msk.msra.mxu0 %vm807_vm6, %v1786_v34 }
 0x5e5   : > { %2272 = vmatprep.subr.mxu0 %v2618_v62  ;;  %v1723_v3 = vpop.permute.xlu0 %1722 }
 0x5e6   : > { %v1780_v58 = vmul.f32 %v1723_v3, %v1652_v4  ;;  %v1718_v39 = vpop.permute.xlu1 %1717 }
 0x5e7   : > { %v1779_v18 = vmul.f32 %v1718_v39, %v1651_v35 }
 0x5e8   : > { %2273 = vmatpush3.xpose.msk.msra.mxu0 %vm807_vm6, %v1785_v16 }
 0x5e9   : > { %2274 = vmatprep.subr.mxu0 %v2618_v62  ;;  %v1713_v33 = vpop.permute.xlu0 %1712 }
 0x5ea   : > { %v1778_v31 = vmul.f32 %v1713_v33, %v1650_v21  ;;  %v1708_v12 = vpop.permute.xlu1 %1707 }
 0x5eb   : > { %v1777_v22 = vmul.f32 %v1708_v12, %v1649_v1 }
 0x5ec   : > { %2275 = vmatpush3.xpose.msk.msra.mxu0 %vm807_vm6, %v1784_v37 }
 0x5ed   : > { %2276 = vmatprep.subr.mxu0 %v2618_v62  ;;  %v1703_v6 = vpop.permute.xlu0 %1702 }
 0x5ee   : > { %v1776_v38 = vmul.f32 %v1703_v6, %v1648_v47  ;;  %v1698_v57 = vpop.permute.xlu1 %1697 }
 0x5ef   : > { %v1775_v19 = vmul.f32 %v1698_v57, %v1647_v32 }
 0x5f0   : > { %2277 = vmatpush3.xpose.msk.msra.mxu0 %vm807_vm6, %v1783_v28 }
 0x5f1   : > { %2278 = vmatprep.subr.mxu0 %v2618_v62  ;;  %v1919_v8 = vpop.permute.xlu0 %1918 }
 0x5f4   : > { %2279 = vmatpush3.xpose.msk.msra.mxu0 %vm807_vm6, %v1782_v29 }
 0x5f5   : > { %2280 = vmatprep.subr.mxu0 %v2618_v62 }
 0x5f8   : > { %2281 = vmatpush3.xpose.msk.msra.mxu0 %vm807_vm6, %v1781_v9 }
 0x5f9   : > { %2282 = vmatprep.subr.mxu0 %v2618_v62 }
 0x5fc   : > { %2283 = vmatpush3.xpose.msk.msra.mxu0 %vm807_vm6, %v1780_v58 }
 0x5fd   : > { %2284 = vmatprep.subr.mxu0 %v2618_v62 }
 0x600   : > { %2285 = vmatpush3.xpose.msk.msra.mxu0 %vm807_vm6, %v1779_v18 }
 0x601   : > { %2286 = vmatprep.subr.mxu0 %v2618_v62 }
 0x604   : > { %2287 = vmatpush3.xpose.msk.msra.mxu0 %vm807_vm6, %v1778_v31 }
 0x605   : > { %2288 = vmatprep.subr.mxu0 %v2618_v62 }
 0x608   : > { %2289 = vmatpush3.xpose.msk.msra.mxu0 %vm807_vm6, %v1777_v22 }
 0x609   : > { %2290 = vmatprep.subr.mxu0 %v2618_v62 }
 0x60c   : > { %2291 = vmatpush3.xpose.msk.msra.mxu0 %vm807_vm6, %v1776_v38 }
 0x60d   : > { %2292 = vmatprep.subr.mxu0 %v2618_v62 }
 0x610   : > { %2293 = vmatpush3.xpose.msk.msra.mxu0 %vm807_vm6, %v1775_v19 }
 0x613   : > { %2295 = vmatmul.mubr.msk.f32.vlgmr.msra.gmra.mxu0 %vm807_vm6, %v1791_v30 }
 0x6d3   : > { %v1909_v54 = vpop.f32.mrf.mxu0 }
 0x6d4   : > { %v1914_v10 = vadd.f32 %v1913_v15, %v1909_v54 }
 0x6d5   : > { %v2296_v20 = vpop.f32.mrf.mxu0 }
 0x6d6   : > { %v1921_v11 = vadd.f32 %v1919_v8, %v1914_v10 }
 0x6d8   : > { %1922 = vst [vmem:[%s350_s27] sm:$0xf] %v1921_v11 }
 0x6d9 PF: > { %s2101_s22 = sshll.u32 %s2595_s10, 1  ;;  %s1939_s17 = sshll.u32 %s350_s27, 4  ;;  %s1940_s17 = int_to_ptr.vmem [resolvable:$true] %s1939_s17 }
 0x6da   : > { %s1935_s23 = sadd.s32 %s2591_s9, %s2101_s22  ;;  %s3399_s18 = sand.u32 1, %s2579_s28  }
 0x6db   : > { %s2102_s12 = sshll.u32 %s1935_s23, 6  ;;  %s1924_s19 = scalar_lea.sflag [#allocation7], %s3399_s18 }
 0x6dc   : > { %s1937_s11 = scalar_lea.hbm %s3377_s8, %s2102_s12  ;;  %s2503_s21 = scalar_lea.vmem %s1940_s17, 64 }
 0x6dd   : > { %p2504_p4 = scmp.ne.s32.totalorder %s1940_s17, %s2503_s21  ;;  %s2620_s26 = smov [#allocation6]  }
 0x6de   : > { %s2507_s30 = sshll.u32 %s2620_s26, 4  ;;  %s2508_s30 = int_to_ptr.vmem [resolvable:$false] %s2507_s30 }
 0x6df   : > { %p2505_p5 = pnand %p2504_p4, %p2728_p6  ;;  %s2509_s10 = scalar_lea.vmem %s2508_s30, 128 }
 0x6e0   : > { %p2510_p9 = scmp.lt.s32.totalorder %s1940_s17, %s2508_s30  ;;  %p2511_p10 = scmp.lt.s32.totalorder %s2509_s10, %s2503_s21 }
 0x6e1   : > { %p2506_p8 = pneg %p2505_p5 }
 0x6e2   : > { %p2512_p11 = por %p2511_p10, %p2510_p9 }
 0x6e4   : > { %p2513_p12 = pnand %p2512_p11, %p2506_p8 }
 0x6e6   : > { %2516 = shalt.err (!%p2513_p12)
}
 0x6e7   : > { %s2517_s27 = scalar_lea.hbm %s1937_s11, 64  ;;  %s2521_s24 = scalar_lea.hbm %s3377_s8, 256 }
 0x6e8   : > { %p2518_p13 = scmp.ne.s32.totalorder %s1937_s11, %s2517_s27  ;;  %p2522_p2 = scmp.lt.s32.totalorder %s1937_s11, %s3377_s8 }
 0x6e9   : > { %p2523_p3 = scmp.lt.s32.totalorder %s2521_s24, %s2517_s27 }
 0x6ea   : > { %p2519_p0 = pnand %p2518_p13, %p2728_p6 }
 0x6eb   : > { %p2524_p4 = por %p2523_p3, %p2522_p2 }
 0x6ec   : > { %p2520_p1 = pneg %p2519_p0 }
 0x6ee   : > { %p2525_p5 = pnand %p2524_p4, %p2520_p1 }
 0x6f0   : > { %2528 = shalt.err (!%p2525_p5)
}
 0x6f1   : > { %2307 = dma.vmem_to_hbm [thread:$0]  (%p2728_p6), %s1940_s17, 64, %s1937_s11, %s1924_s19  }
 0x6f2 PF: > { %s3400_s22 = sld [smem:[#allocation9_spill]]  ;;  %p2313_p8 = scmp.ge.s32.totalorder %s2611_s14, 2 }
 0x6f4   : > { %p2310_p9 = pnand %p2313_p8, %p2735_p7 }
 0x6f6   : > { %p2311_p10 = pneg %p2310_p9 }
 0x6f8   : > { %s1951_s12 = sand.u32 1, %s3400_s22  }
 0x6f9   : > { %s1952_s13 = scalar_lea.sflag [#allocation7], %s1951_s12 }
 0x6fa   : > { %2570 = dma.done.wait (%p2311_p10), %s1952_s13, 64  }
 0x6fb   : > { %2572 = vsyncadd (%p2311_p10), %s1952_s13, 4294967232  ;;  %s21_s14 = sadd.s32 1, %s2611_s14   ;;  %s3402_s29 = sld [smem:[#allocation10_spill]] }
 0x6fc   : > { %p18_p11 = scmp.ge.s32.totalorder %s21_s14, 10   ;;  %s3403_s18 = sld [smem:[#allocation18_spill]] }
 0x6fd   : > { %s3404_s30 = sld [smem:[#allocation11_spill]]  ;;  %s3410_s27 = smov %s2579_s28 }
 0x6fe   : > { %s3405_s9 = sld [smem:[#allocation12_spill]]  ;;  %20 = sbr.rel (!%p18_p11) target bundleno = 6 (0x6), region = 98 }
 0x6ff   : > { %s3406_s10 = sld [smem:[#allocation13_spill]] }
 0x700   : > { %s3407_s11 = sld [smem:[#allocation14_spill]] }
 0x701   : > { %s3408_s12 = sld [smem:[#allocation15_spill]]  ;;  %s3411_s28 = smov %s3402_s29 }
 0x702   : > { %s3409_s13 = sld [smem:[#allocation17_spill]]  ;;  %s3412_s29 = smov %s3403_s18 }
 0x703   :  { %1957 = vsyncpa [#allocation7], 1 }
 0x704   :  { %1959 = vsyncpa [#allocation7 + $0x1], 1 }

</bundles_post_ra>
